<compile_context>
chip_gen: v6e
topology: v6e:2x2x1
jax: 0.10.0
libtpu: 0.0.40
codegen_flags: <defaults>
</compile_context>

<pallas_src>
import math
import functools

import jax
import jax.numpy as jnp
from jax.experimental import pallas as pl
from jax.experimental.pallas import tpu as pltpu


# ----------------------------------------------------------------------------
# Fused encoder-stack kernel: grid = (batch, layer); one batch row per step,
# all layers run back-to-back with the activation resident in the output block.
# ----------------------------------------------------------------------------
def encoder_stack_kernel(x_ref,
                         wqkv_ref, bqkv_ref, wo_ref, bo_ref, ln1g_ref, ln1b_ref,
                         w1_ref, b1_ref, w2_ref, b2_ref, ln2g_ref, ln2b_ref,
                         o_ref, *, h, d_k):
    eps = 1e-5
    l = pl.program_id(1)

    # Layer 0 seeds the resident output block with the embedded+PE input.  The
    # output block index is constant over the layer axis, so it stays in VMEM
    # and carries the activation layer-to-layer (written back to HBM once).
    @pl.when(l == 0)
    def _():
        o_ref[0] = x_ref[0]

    x = o_ref[0].astype(jnp.float32)                       # (S, D)
    x_bf = x.astype(jnp.bfloat16)
    g = 3 * h

    # --- multi-head attention: heads as a batch dim (no lane slicing / transposes)
    xg = jnp.broadcast_to(x_bf[None], (g,) + x_bf.shape)   # (3h, S, D)
    qkv = jnp.einsum('gsd,gdk->gsk', xg, wqkv_ref[0],
                     preferred_element_type=jnp.float32) + bqkv_ref[0]   # (3h, S, d_k)
    q = qkv[0:h]
    k = qkv[h:2 * h]
    v = qkv[2 * h:3 * h]

    scale = 1.0 / math.sqrt(d_k)
    s = jnp.einsum('hsd,htd->hst', q.astype(jnp.bfloat16), k.astype(jnp.bfloat16),
                   preferred_element_type=jnp.float32) * scale           # (h, S, S)
    s = s - jnp.max(s, axis=-1, keepdims=True)
    p = jnp.exp(s)
    p = p * pl.reciprocal(jnp.sum(p, axis=-1, keepdims=True), approx=True)
    ctx = jnp.einsum('hst,htd->hsd', p.astype(jnp.bfloat16), v.astype(jnp.bfloat16),
                     preferred_element_type=jnp.float32)                 # (h, S, d_k)

    # output projection: sum_h ctx_h @ Wo_h  ==  concat(heads) @ Wo
    attn = jnp.einsum('hsd,hdm->hsm', ctx.astype(jnp.bfloat16), wo_ref[0],
                      preferred_element_type=jnp.float32)                # (h, S, D)
    attn = jnp.sum(attn, axis=0) + bo_ref[0]                             # (S, D)

    # residual + LayerNorm 1 (post-norm)
    y = x + attn
    mu = jnp.mean(y, axis=-1, keepdims=True)
    var = jnp.mean((y - mu) ** 2, axis=-1, keepdims=True)
    y = (y - mu) * jax.lax.rsqrt(var + eps) * ln1g_ref[0] + ln1b_ref[0]

    # --- position-wise feed-forward
    hid = jnp.dot(y.astype(jnp.bfloat16), w1_ref[0],
                  preferred_element_type=jnp.float32) + b1_ref[0]
    hid = jnp.maximum(hid, 0.0)
    f = jnp.dot(hid.astype(jnp.bfloat16), w2_ref[0],
                preferred_element_type=jnp.float32) + b2_ref[0]

    # residual + LayerNorm 2
    z = y + f
    mu2 = jnp.mean(z, axis=-1, keepdims=True)
    var2 = jnp.mean((z - mu2) ** 2, axis=-1, keepdims=True)
    z = (z - mu2) * jax.lax.rsqrt(var2 + eps) * ln2g_ref[0] + ln2b_ref[0]

    o_ref[0] = z.astype(o_ref.dtype)


def encoder_stack(x, stacked, *, h):
    """x: (B, S, D) float32 (already embedded + positionally encoded).
    stacked: dict of per-layer weights stacked along a leading layer axis."""
    B, S, D = x.shape
    d_k = D // h
    L = stacked["wqkv"].shape[0]

    names = ("wqkv", "bqkv", "wo", "bo", "ln1_g", "ln1_b",
             "w1", "b1", "w2", "b2", "ln2_g", "ln2_b")
    ws = [stacked[n] for n in names]

    def w_spec(a):
        nd = a.ndim
        return pl.BlockSpec((1,) + a.shape[1:],
                            lambda b, l, _nd=nd: (l,) + (0,) * (_nd - 1))

    kernel = functools.partial(encoder_stack_kernel, h=h, d_k=d_k)
    return pl.pallas_call(
        kernel,
        out_shape=jax.ShapeDtypeStruct((B, S, D), jnp.float32),
        grid_spec=pltpu.PrefetchScalarGridSpec(
            num_scalar_prefetch=0,
            grid=(B, L),                                   # layer axis innermost
            in_specs=[pl.BlockSpec((1, S, D), lambda b, l: (b, 0, 0))]
                     + [w_spec(w) for w in ws],
            out_specs=pl.BlockSpec((1, S, D), lambda b, l: (b, 0, 0)),
        ),
        compiler_params=pltpu.CompilerParams(
            dimension_semantics=("parallel", "arbitrary")),
    )(x, *ws)


# ----------------------------------------------------------------------------
# Parameter construction (weights re-laid-out per head, matmul weights in bf16)
# and glue (embedding gather, sinusoidal PE) in plain JAX.
# ----------------------------------------------------------------------------
def init_params(key, num_tokens, N, h, d_model, d_ff):
    d_k = d_model // h
    keys = jax.random.split(key, 1 + N)
    emb = jax.random.normal(keys[0], (num_tokens, d_model), jnp.float32) * 0.02

    def per_layer(lk):
        k = jax.random.split(lk, 6)
        s_attn = 1.0 / math.sqrt(d_model)
        s_ff1 = 1.0 / math.sqrt(d_model)
        s_ff2 = 1.0 / math.sqrt(d_ff)
        wq = jax.random.uniform(k[0], (d_model, d_model), jnp.float32, -s_attn, s_attn)
        wk = jax.random.uniform(k[1], (d_model, d_model), jnp.float32, -s_attn, s_attn)
        wv = jax.random.uniform(k[2], (d_model, d_model), jnp.float32, -s_attn, s_attn)
        wo = jax.random.uniform(k[3], (d_model, d_model), jnp.float32, -s_attn, s_attn)
        w1 = jax.random.uniform(k[4], (d_model, d_ff), jnp.float32, -s_ff1, s_ff1)
        w2 = jax.random.uniform(k[5], (d_ff, d_model), jnp.float32, -s_ff2, s_ff2)

        def heads_in(w):   # (D, D) -> (h, D, d_k): head i owns output cols [i*d_k, (i+1)*d_k)
            return w.reshape(d_model, h, d_k).transpose(1, 0, 2)

        wqkv = jnp.concatenate([heads_in(wq), heads_in(wk), heads_in(wv)], axis=0)  # (3h, D, d_k)
        wo_h = wo.reshape(h, d_k, d_model)                                          # (h, d_k, D)
        return {
            "wqkv": wqkv.astype(jnp.bfloat16),
            "bqkv": jnp.zeros((3 * h, 1, d_k), jnp.float32),
            "wo": wo_h.astype(jnp.bfloat16),
            "bo": jnp.zeros((1, d_model), jnp.float32),
            "ln1_g": jnp.ones((1, d_model), jnp.float32),
            "ln1_b": jnp.zeros((1, d_model), jnp.float32),
            "w1": w1.astype(jnp.bfloat16),
            "b1": jnp.zeros((1, d_ff), jnp.float32),
            "w2": w2.astype(jnp.bfloat16),
            "b2": jnp.zeros((1, d_model), jnp.float32),
            "ln2_g": jnp.ones((1, d_model), jnp.float32),
            "ln2_b": jnp.zeros((1, d_model), jnp.float32),
        }

    layers = [per_layer(keys[1 + i]) for i in range(N)]
    stacked = {n: jnp.stack([p[n] for p in layers], axis=0) for n in layers[0]}
    return emb, stacked


def sinusoidal_pe(seq_len, d_model):
    pos = jnp.arange(seq_len, dtype=jnp.float32)[:, None]
    i = jnp.arange(0, d_model, 2, dtype=jnp.float32)[None, :]
    div = jnp.exp(-(jnp.log(10000.0) / d_model) * i)
    pe = jnp.zeros((seq_len, d_model), jnp.float32)
    pe = pe.at[:, 0::2].set(jnp.sin(pos * div))
    pe = pe.at[:, 1::2].set(jnp.cos(pos * div))
    return pe


def encoder_forward(tokens, emb, stacked, *, h):
    # token embedding (gather) + positional encoding -> float32 (done in plain JAX)
    x = jnp.take(emb, tokens, axis=0)                                   # (B, S, D)
    x = (x + sinusoidal_pe(tokens.shape[1], emb.shape[1])[None]).astype(jnp.float32)
    return encoder_stack(x, stacked, h=h)


# ----------------------------------------------------------------------------
# Pure-JAX reference (same bf16-quantized weights, f32 math) for a sanity check.
# ----------------------------------------------------------------------------
def encoder_reference(tokens, emb, stacked, *, h):
    x = jnp.take(emb, tokens, axis=0)
    x = (x + sinusoidal_pe(tokens.shape[1], emb.shape[1])[None]).astype(jnp.float32)
    L = stacked["wqkv"].shape[0]
    D = x.shape[-1]
    d_k = D // h
    eps = 1e-5

    def ln(v, g, b):
        mu = jnp.mean(v, -1, keepdims=True)
        var = jnp.mean((v - mu) ** 2, -1, keepdims=True)
        return (v - mu) / jnp.sqrt(var + eps) * g + b

    for l in range(L):
        wqkv = stacked["wqkv"][l].astype(jnp.float32)
        wo = stacked["wo"][l].astype(jnp.float32)
        qkv = jnp.einsum('bsd,gdk->bgsk', x, wqkv) + stacked["bqkv"][l]
        q, k, v = qkv[:, :h], qkv[:, h:2 * h], qkv[:, 2 * h:]
        s = jnp.einsum('bhsd,bhtd->bhst', q, k) / math.sqrt(d_k)
        p = jax.nn.softmax(s, axis=-1)
        ctx = jnp.einsum('bhst,bhtd->bhsd', p, v)
        attn = jnp.einsum('bhsd,hdm->bsm', ctx, wo) + stacked["bo"][l]
        y = ln(x + attn, stacked["ln1_g"][l], stacked["ln1_b"][l])
        hid = jnp.maximum(jnp.einsum('bsd,df->bsf', y, stacked["w1"][l].astype(jnp.float32))
                          + stacked["b1"][l], 0.0)
        f = jnp.einsum('bsf,fd->bsd', hid, stacked["w2"][l].astype(jnp.float32)) + stacked["b2"][l]
        x = ln(y + f, stacked["ln2_g"][l], stacked["ln2_b"][l])
    return x


# ----------------------------------------------------------------------------
if __name__ == "__main__":
    num_tokens = 100
    N = 2            # encoder layers
    h = 4            # heads
    d_model = 128    # lane-dense (multiple of 128); d_k = 32
    d_ff = 4 * d_model
    batch, seq = 2, 8

    key = jax.random.PRNGKey(0)
    k_tok, k_par = jax.random.split(key)
    tokens = jax.random.randint(k_tok, (batch, seq), 0, num_tokens, dtype=jnp.int32)
    emb, stacked = init_params(k_par, num_tokens, N, h, d_model, d_ff)

    out = encoder_forward(tokens, emb, stacked, h=h)
    jax.block_until_ready(out)
    assert out.shape == (batch, seq, d_model) and out.dtype == jnp.float32

    ref = encoder_reference(tokens, emb, stacked, h=h)
    max_diff = float(jnp.max(jnp.abs(out - ref)))
    assert max_diff < 0.2, f"kernel/reference mismatch: max abs diff {max_diff}"

    print("KERNEL_OK")
</pallas_src>

<mosaic_0001>
module attributes {stable_mosaic.version = 11 : i64} {
  func.func @encoder_stack_kernel(%arg0: i32, %arg1: i32, %arg2: memref<1x8x128xf32, #tpu.memory_space<vmem>>, %arg3: memref<1x12x128x32xbf16, #tpu.memory_space<vmem>>, %arg4: memref<1x12x1x32xf32, #tpu.memory_space<vmem>>, %arg5: memref<1x4x32x128xbf16, #tpu.memory_space<vmem>>, %arg6: memref<1x1x128xf32, #tpu.memory_space<vmem>>, %arg7: memref<1x1x128xf32, #tpu.memory_space<vmem>>, %arg8: memref<1x1x128xf32, #tpu.memory_space<vmem>>, %arg9: memref<1x128x512xbf16, #tpu.memory_space<vmem>>, %arg10: memref<1x1x512xf32, #tpu.memory_space<vmem>>, %arg11: memref<1x512x128xbf16, #tpu.memory_space<vmem>>, %arg12: memref<1x1x128xf32, #tpu.memory_space<vmem>>, %arg13: memref<1x1x128xf32, #tpu.memory_space<vmem>>, %arg14: memref<1x1x128xf32, #tpu.memory_space<vmem>>, %arg15: memref<1x8x128xf32, #tpu.memory_space<vmem>>) attributes {dimension_semantics = [#tpu.dimension_semantics<parallel>, #tpu.dimension_semantics<arbitrary>], iteration_bounds = array<i64: 2, 2>, scalar_prefetch = 0 : i64, scratch_operands = 0 : i64, tpu.core_type = #tpu.core_type<tc>, window_params = [{transform_indices = @transform_0, window_bounds = array<i64: 1, 8, 128>}, {transform_indices = @transform_1, window_bounds = array<i64: 1, 12, 128, 32>}, {transform_indices = @transform_2, window_bounds = array<i64: 1, 12, 1, 32>}, {transform_indices = @transform_3, window_bounds = array<i64: 1, 4, 32, 128>}, {transform_indices = @transform_4, window_bounds = array<i64: 1, 1, 128>}, {transform_indices = @transform_5, window_bounds = array<i64: 1, 1, 128>}, {transform_indices = @transform_6, window_bounds = array<i64: 1, 1, 128>}, {transform_indices = @transform_7, window_bounds = array<i64: 1, 128, 512>}, {transform_indices = @transform_8, window_bounds = array<i64: 1, 1, 512>}, {transform_indices = @transform_9, window_bounds = array<i64: 1, 512, 128>}, {transform_indices = @transform_10, window_bounds = array<i64: 1, 1, 128>}, {transform_indices = @transform_11, window_bounds = array<i64: 1, 1, 128>}, {transform_indices = @transform_12, window_bounds = array<i64: 1, 1, 128>}, {transform_indices = @transform_13, window_bounds = array<i64: 1, 8, 128>}]} {
    %c0_i32 = arith.constant 0 : i32
    %0 = arith.cmpi eq, %arg1, %c0_i32 : i32
    %1 = arith.extui %0 : i1 to i32
    %c0_i32_0 = arith.constant 0 : i32
    %2 = arith.cmpi ne, %1, %c0_i32_0 : i32
    scf.if %2 {
      %c0_65 = arith.constant 0 : index
      %c0_66 = arith.constant 0 : index
      %c0_67 = arith.constant 0 : index
      %121 = vector.load %arg2[%c0_65, %c0_66, %c0_67] : memref<1x8x128xf32, #tpu.memory_space<vmem>>, vector<1x8x128xf32>
      %122 = vector.shape_cast %121 : vector<1x8x128xf32> to vector<8x128xf32>
      %c0_68 = arith.constant 0 : index
      %c0_69 = arith.constant 0 : index
      %c0_70 = arith.constant 0 : index
      %123 = vector.load %arg15[%c0_68, %c0_69, %c0_70] : memref<1x8x128xf32, #tpu.memory_space<vmem>>, vector<1x8x128xf32>
      %124 = vector.shape_cast %123 : vector<1x8x128xf32> to vector<8x128xf32>
      %125 = vector.shape_cast %122 : vector<8x128xf32> to vector<1x8x128xf32>
      tpu.vector_store %arg15[%c0_68, %c0_69, %c0_70], %125 {strides = array<i32>} : memref<1x8x128xf32, #tpu.memory_space<vmem>>, vector<1x8x128xf32>,
    } else {
    }
    %c0 = arith.constant 0 : index
    %c0_1 = arith.constant 0 : index
    %c0_2 = arith.constant 0 : index
    %3 = vector.load %arg15[%c0, %c0_1, %c0_2] : memref<1x8x128xf32, #tpu.memory_space<vmem>>, vector<1x8x128xf32>
    %4 = vector.shape_cast %3 : vector<1x8x128xf32> to vector<8x128xf32>
    %5 = arith.truncf %4 : vector<8x128xf32> to vector<8x128xbf16>
    %6 = vector.shape_cast %5 : vector<8x128xbf16> to vector<1x8x128xbf16>
    %7 = vector.shape_cast %6 : vector<1x8x128xbf16> to vector<1x8x128xbf16>
    %8 = vector.broadcast %7 : vector<1x8x128xbf16> to vector<12x8x128xbf16>
    %c0_3 = arith.constant 0 : index
    %c0_4 = arith.constant 0 : index
    %c0_5 = arith.constant 0 : index
    %c0_6 = arith.constant 0 : index
    %9 = vector.load %arg3[%c0_3, %c0_4, %c0_5, %c0_6] : memref<1x12x128x32xbf16, #tpu.memory_space<vmem>>, vector<1x12x128x32xbf16>
    %10 = vector.shape_cast %9 : vector<1x12x128x32xbf16> to vector<12x128x32xbf16>
    "tpu.trace_start"() <{level = 10 : i32, message = "gsd,gdk->gsk"}> : () -> ()
    %cst = arith.constant dense<0.000000e+00> : vector<12x8x32xf32>
    %11 = tpu.matmul %8, %10, %cst {dimension_numbers = #tpu.dot_dimension_numbers<[2], [1], [1], [2], [0, 0, 0, 1, 1, 2], [0], [0]>} : vector<12x8x128xbf16>, vector<12x128x32xbf16>, vector<12x8x32xf32> -> vector<12x8x32xf32>
    "tpu.trace_stop"() : () -> ()
    %c0_7 = arith.constant 0 : index
    %c0_8 = arith.constant 0 : index
    %c0_9 = arith.constant 0 : index
    %c0_10 = arith.constant 0 : index
    %12 = vector.load %arg4[%c0_7, %c0_8, %c0_9, %c0_10] : memref<1x12x1x32xf32, #tpu.memory_space<vmem>>, vector<1x12x1x32xf32>
    %13 = vector.shape_cast %12 : vector<1x12x1x32xf32> to vector<12x1x32xf32>
    %14 = vector.broadcast %13 : vector<12x1x32xf32> to vector<12x8x32xf32>
    %15 = arith.addf %11, %14 : vector<12x8x32xf32>
    %16 = vector.extract_strided_slice %15 {offsets = [0, 0, 0], sizes = [4, 8, 32], strides = [1, 1, 1]} : vector<12x8x32xf32> to vector<4x8x32xf32>
    %17 = vector.extract_strided_slice %15 {offsets = [4, 0, 0], sizes = [4, 8, 32], strides = [1, 1, 1]} : vector<12x8x32xf32> to vector<4x8x32xf32>
    %18 = vector.extract_strided_slice %15 {offsets = [8, 0, 0], sizes = [4, 8, 32], strides = [1, 1, 1]} : vector<12x8x32xf32> to vector<4x8x32xf32>
    %19 = arith.truncf %16 : vector<4x8x32xf32> to vector<4x8x32xbf16>
    %20 = arith.truncf %17 : vector<4x8x32xf32> to vector<4x8x32xbf16>
    "tpu.trace_start"() <{level = 10 : i32, message = "hsd,htd->hst"}> : () -> ()
    %cst_11 = arith.constant dense<0.000000e+00> : vector<4x8x8xf32>
    %21 = tpu.matmul %19, %20, %cst_11 {dimension_numbers = #tpu.dot_dimension_numbers<[2], [2], [1], [1], [0, 0, 0, 1, 1, 1], [0], [0]>} : vector<4x8x32xbf16>, vector<4x8x32xbf16>, vector<4x8x8xf32> -> vector<4x8x8xf32>
    "tpu.trace_stop"() : () -> ()
    %cst_12 = arith.constant 0.176776692 : f32
    %22 = vector.broadcast %cst_12 : f32 to vector<4x8x8xf32>
    %23 = arith.mulf %21, %22 : vector<4x8x8xf32>
    %cst_13 = arith.constant dense<0xFF800000> : vector<4x8xf32>
    %24 = vector.multi_reduction <maximumf>, %23, %cst_13 [2] : vector<4x8x8xf32> to vector<4x8xf32>
    %25 = vector.shape_cast %24 : vector<4x8xf32> to vector<4x8x1xf32>
    %26 = vector.broadcast %25 : vector<4x8x1xf32> to vector<4x8x8xf32>
    %27 = arith.subf %23, %26 : vector<4x8x8xf32>
    %28 = math.exp %27 : vector<4x8x8xf32>
    %cst_14 = arith.constant dense<0.000000e+00> : vector<4x8xf32>
    %29 = vector.multi_reduction <add>, %28, %cst_14 [2] : vector<4x8x8xf32> to vector<4x8xf32>
    %30 = vector.shape_cast %29 : vector<4x8xf32> to vector<4x8x1xf32>
    %31 = tpu.reciprocal %30 {approx = true} : vector<4x8x1xf32> -> vector<4x8x1xf32>
    %32 = vector.broadcast %31 : vector<4x8x1xf32> to vector<4x8x8xf32>
    %33 = arith.mulf %28, %32 : vector<4x8x8xf32>
    %34 = arith.truncf %33 : vector<4x8x8xf32> to vector<4x8x8xbf16>
    %35 = arith.truncf %18 : vector<4x8x32xf32> to vector<4x8x32xbf16>
    "tpu.trace_start"() <{level = 10 : i32, message = "hst,htd->hsd"}> : () -> ()
    %cst_15 = arith.constant dense<0.000000e+00> : vector<4x8x32xf32>
    %36 = tpu.matmul %34, %35, %cst_15 {dimension_numbers = #tpu.dot_dimension_numbers<[2], [1], [1], [2], [0, 0, 0, 1, 1, 2], [0], [0]>} : vector<4x8x8xbf16>, vector<4x8x32xbf16>, vector<4x8x32xf32> -> vector<4x8x32xf32>
    "tpu.trace_stop"() : () -> ()
    %37 = arith.truncf %36 : vector<4x8x32xf32> to vector<4x8x32xbf16>
    %c0_16 = arith.constant 0 : index
    %c0_17 = arith.constant 0 : index
    %c0_18 = arith.constant 0 : index
    %c0_19 = arith.constant 0 : index
    %38 = vector.load %arg5[%c0_16, %c0_17, %c0_18, %c0_19] : memref<1x4x32x128xbf16, #tpu.memory_space<vmem>>, vector<1x4x32x128xbf16>
    %39 = vector.shape_cast %38 : vector<1x4x32x128xbf16> to vector<4x32x128xbf16>
    "tpu.trace_start"() <{level = 10 : i32, message = "hsd,hdm->hsm"}> : () -> ()
    %cst_20 = arith.constant dense<0.000000e+00> : vector<4x8x128xf32>
    %40 = tpu.matmul %37, %39, %cst_20 {dimension_numbers = #tpu.dot_dimension_numbers<[2], [1], [1], [2], [0, 0, 0, 1, 1, 2], [0], [0]>} : vector<4x8x32xbf16>, vector<4x32x128xbf16>, vector<4x8x128xf32> -> vector<4x8x128xf32>
    "tpu.trace_stop"() : () -> ()
    %cst_21 = arith.constant dense<0.000000e+00> : vector<8x128xf32>
    %41 = vector.multi_reduction <add>, %40, %cst_21 [0] : vector<4x8x128xf32> to vector<8x128xf32>
    %c0_22 = arith.constant 0 : index
    %c0_23 = arith.constant 0 : index
    %c0_24 = arith.constant 0 : index
    %42 = vector.load %arg6[%c0_22, %c0_23, %c0_24] : memref<1x1x128xf32, #tpu.memory_space<vmem>>, vector<1x1x128xf32>
    %43 = vector.shape_cast %42 : vector<1x1x128xf32> to vector<1x128xf32>
    %44 = vector.broadcast %43 : vector<1x128xf32> to vector<8x128xf32>
    %45 = arith.addf %41, %44 : vector<8x128xf32>
    %46 = arith.addf %4, %45 : vector<8x128xf32>
    %cst_25 = arith.constant dense<0.000000e+00> : vector<8xf32>
    %47 = vector.multi_reduction <add>, %46, %cst_25 [1] : vector<8x128xf32> to vector<8xf32>
    %48 = vector.shape_cast %47 : vector<8xf32> to vector<8x1xf32>
    %cst_26 = arith.constant 1.280000e+02 : f32
    %49 = vector.broadcast %cst_26 : f32 to vector<8x1xf32>
    %50 = arith.divf %48, %49 : vector<8x1xf32>
    %51 = vector.broadcast %50 : vector<8x1xf32> to vector<8x128xf32>
    %52 = arith.subf %46, %51 : vector<8x128xf32>
    %53 = arith.mulf %52, %52 : vector<8x128xf32>
    %cst_27 = arith.constant dense<0.000000e+00> : vector<8xf32>
    %54 = vector.multi_reduction <add>, %53, %cst_27 [1] : vector<8x128xf32> to vector<8xf32>
    %55 = vector.shape_cast %54 : vector<8xf32> to vector<8x1xf32>
    %cst_28 = arith.constant 1.280000e+02 : f32
    %56 = vector.broadcast %cst_28 : f32 to vector<8x1xf32>
    %57 = arith.divf %55, %56 : vector<8x1xf32>
    %58 = vector.broadcast %50 : vector<8x1xf32> to vector<8x128xf32>
    %59 = arith.subf %46, %58 : vector<8x128xf32>
    %cst_29 = arith.constant 9.99999974E-6 : f32
    %60 = vector.broadcast %cst_29 : f32 to vector<8x1xf32>
    %61 = arith.addf %57, %60 : vector<8x1xf32>
    %62 = math.rsqrt %61 : vector<8x1xf32>
    %63 = vector.broadcast %62 : vector<8x1xf32> to vector<8x128xf32>
    %64 = arith.mulf %59, %63 : vector<8x128xf32>
    %c0_30 = arith.constant 0 : index
    %c0_31 = arith.constant 0 : index
    %c0_32 = arith.constant 0 : index
    %65 = vector.load %arg7[%c0_30, %c0_31, %c0_32] : memref<1x1x128xf32, #tpu.memory_space<vmem>>, vector<1x1x128xf32>
    %66 = vector.shape_cast %65 : vector<1x1x128xf32> to vector<1x128xf32>
    %67 = vector.broadcast %66 : vector<1x128xf32> to vector<8x128xf32>
    %68 = arith.mulf %64, %67 : vector<8x128xf32>
    %c0_33 = arith.constant 0 : index
    %c0_34 = arith.constant 0 : index
    %c0_35 = arith.constant 0 : index
    %69 = vector.load %arg8[%c0_33, %c0_34, %c0_35] : memref<1x1x128xf32, #tpu.memory_space<vmem>>, vector<1x1x128xf32>
    %70 = vector.shape_cast %69 : vector<1x1x128xf32> to vector<1x128xf32>
    %71 = vector.broadcast %70 : vector<1x128xf32> to vector<8x128xf32>
    %72 = arith.addf %68, %71 : vector<8x128xf32>
    %73 = arith.truncf %72 : vector<8x128xf32> to vector<8x128xbf16>
    %c0_36 = arith.constant 0 : index
    %c0_37 = arith.constant 0 : index
    %c0_38 = arith.constant 0 : index
    %74 = vector.load %arg9[%c0_36, %c0_37, %c0_38] : memref<1x128x512xbf16, #tpu.memory_space<vmem>>, vector<1x128x512xbf16>
    %75 = vector.shape_cast %74 : vector<1x128x512xbf16> to vector<128x512xbf16>
    %cst_39 = arith.constant dense<0.000000e+00> : vector<8x512xf32>
    %76 = tpu.matmul %73, %75, %cst_39 {dimension_numbers = #tpu.dot_dimension_numbers<[1], [0], [0], [1], [0, 0, 1, 1], [], []>} : vector<8x128xbf16>, vector<128x512xbf16>, vector<8x512xf32> -> vector<8x512xf32>
    %c0_40 = arith.constant 0 : index
    %c0_41 = arith.constant 0 : index
    %c0_42 = arith.constant 0 : index
    %77 = vector.load %arg10[%c0_40, %c0_41, %c0_42] : memref<1x1x512xf32, #tpu.memory_space<vmem>>, vector<1x1x512xf32>
    %78 = vector.shape_cast %77 : vector<1x1x512xf32> to vector<1x512xf32>
    %79 = vector.broadcast %78 : vector<1x512xf32> to vector<8x512xf32>
    %80 = arith.addf %76, %79 : vector<8x512xf32>
    %cst_43 = arith.constant 0.000000e+00 : f32
    %81 = vector.broadcast %cst_43 : f32 to vector<8x512xf32>
    %82 = arith.maximumf %80, %81 : vector<8x512xf32>
    %83 = arith.truncf %82 : vector<8x512xf32> to vector<8x512xbf16>
    %c0_44 = arith.constant 0 : index
    %c0_45 = arith.constant 0 : index
    %c0_46 = arith.constant 0 : index
    %84 = vector.load %arg11[%c0_44, %c0_45, %c0_46] : memref<1x512x128xbf16, #tpu.memory_space<vmem>>, vector<1x512x128xbf16>
    %85 = vector.shape_cast %84 : vector<1x512x128xbf16> to vector<512x128xbf16>
    %cst_47 = arith.constant dense<0.000000e+00> : vector<8x128xf32>
    %86 = tpu.matmul %83, %85, %cst_47 {dimension_numbers = #tpu.dot_dimension_numbers<[1], [0], [0], [1], [0, 0, 1, 1], [], []>} : vector<8x512xbf16>, vector<512x128xbf16>, vector<8x128xf32> -> vector<8x128xf32>
    %c0_48 = arith.constant 0 : index
    %c0_49 = arith.constant 0 : index
    %c0_50 = arith.constant 0 : index
    %87 = vector.load %arg12[%c0_48, %c0_49, %c0_50] : memref<1x1x128xf32, #tpu.memory_space<vmem>>, vector<1x1x128xf32>
    %88 = vector.shape_cast %87 : vector<1x1x128xf32> to vector<1x128xf32>
    %89 = vector.broadcast %88 : vector<1x128xf32> to vector<8x128xf32>
    %90 = arith.addf %86, %89 : vector<8x128xf32>
    %91 = arith.addf %72, %90 : vector<8x128xf32>
    %cst_51 = arith.constant dense<0.000000e+00> : vector<8xf32>
    %92 = vector.multi_reduction <add>, %91, %cst_51 [1] : vector<8x128xf32> to vector<8xf32>
    %93 = vector.shape_cast %92 : vector<8xf32> to vector<8x1xf32>
    %cst_52 = arith.constant 1.280000e+02 : f32
    %94 = vector.broadcast %cst_52 : f32 to vector<8x1xf32>
    %95 = arith.divf %93, %94 : vector<8x1xf32>
    %96 = vector.broadcast %95 : vector<8x1xf32> to vector<8x128xf32>
    %97 = arith.subf %91, %96 : vector<8x128xf32>
    %98 = arith.mulf %97, %97 : vector<8x128xf32>
    %cst_53 = arith.constant dense<0.000000e+00> : vector<8xf32>
    %99 = vector.multi_reduction <add>, %98, %cst_53 [1] : vector<8x128xf32> to vector<8xf32>
    %100 = vector.shape_cast %99 : vector<8xf32> to vector<8x1xf32>
    %cst_54 = arith.constant 1.280000e+02 : f32
    %101 = vector.broadcast %cst_54 : f32 to vector<8x1xf32>
    %102 = arith.divf %100, %101 : vector<8x1xf32>
    %103 = vector.broadcast %95 : vector<8x1xf32> to vector<8x128xf32>
    %104 = arith.subf %91, %103 : vector<8x128xf32>
    %cst_55 = arith.constant 9.99999974E-6 : f32
    %105 = vector.broadcast %cst_55 : f32 to vector<8x1xf32>
    %106 = arith.addf %102, %105 : vector<8x1xf32>
    %107 = math.rsqrt %106 : vector<8x1xf32>
    %108 = vector.broadcast %107 : vector<8x1xf32> to vector<8x128xf32>
    %109 = arith.mulf %104, %108 : vector<8x128xf32>
    %c0_56 = arith.constant 0 : index
    %c0_57 = arith.constant 0 : index
    %c0_58 = arith.constant 0 : index
    %110 = vector.load %arg13[%c0_56, %c0_57, %c0_58] : memref<1x1x128xf32, #tpu.memory_space<vmem>>, vector<1x1x128xf32>
    %111 = vector.shape_cast %110 : vector<1x1x128xf32> to vector<1x128xf32>
    %112 = vector.broadcast %111 : vector<1x128xf32> to vector<8x128xf32>
    %113 = arith.mulf %109, %112 : vector<8x128xf32>
    %c0_59 = arith.constant 0 : index
    %c0_60 = arith.constant 0 : index
    %c0_61 = arith.constant 0 : index
    %114 = vector.load %arg14[%c0_59, %c0_60, %c0_61] : memref<1x1x128xf32, #tpu.memory_space<vmem>>, vector<1x1x128xf32>
    %115 = vector.shape_cast %114 : vector<1x1x128xf32> to vector<1x128xf32>
    %116 = vector.broadcast %115 : vector<1x128xf32> to vector<8x128xf32>
    %117 = arith.addf %113, %116 : vector<8x128xf32>
    %c0_62 = arith.constant 0 : index
    %c0_63 = arith.constant 0 : index
    %c0_64 = arith.constant 0 : index
    %118 = vector.load %arg15[%c0_62, %c0_63, %c0_64] : memref<1x8x128xf32, #tpu.memory_space<vmem>>, vector<1x8x128xf32>
    %119 = vector.shape_cast %118 : vector<1x8x128xf32> to vector<8x128xf32>
    %120 = vector.shape_cast %117 : vector<8x128xf32> to vector<1x8x128xf32>
    tpu.vector_store %arg15[%c0_62, %c0_63, %c0_64], %120 {strides = array<i32>} : memref<1x8x128xf32, #tpu.memory_space<vmem>>, vector<1x8x128xf32>,
    return
  }
  func.func @transform_0(%arg0: i32, %arg1: i32) -> (i32, i32, i32) {
    %c0_i32 = arith.constant 0 : i32
    %c0_i32_0 = arith.constant 0 : i32
    %c0_i32_1 = arith.constant 0 : i32
    return %arg0, %c0_i32, %c0_i32_0 : i32, i32, i32
  }
  func.func @transform_1(%arg0: i32, %arg1: i32) -> (i32, i32, i32, i32) {
    %c0_i32 = arith.constant 0 : i32
    %c0_i32_0 = arith.constant 0 : i32
    %c0_i32_1 = arith.constant 0 : i32
    %c0_i32_2 = arith.constant 0 : i32
    return %arg1, %c0_i32, %c0_i32_0, %c0_i32_1 : i32, i32, i32, i32
  }
  func.func @transform_2(%arg0: i32, %arg1: i32) -> (i32, i32, i32, i32) {
    %c0_i32 = arith.constant 0 : i32
    %c0_i32_0 = arith.constant 0 : i32
    %c0_i32_1 = arith.constant 0 : i32
    %c0_i32_2 = arith.constant 0 : i32
    return %arg1, %c0_i32, %c0_i32_0, %c0_i32_1 : i32, i32, i32, i32
  }
  func.func @transform_3(%arg0: i32, %arg1: i32) -> (i32, i32, i32, i32) {
    %c0_i32 = arith.constant 0 : i32
    %c0_i32_0 = arith.constant 0 : i32
    %c0_i32_1 = arith.constant 0 : i32
    %c0_i32_2 = arith.constant 0 : i32
    return %arg1, %c0_i32, %c0_i32_0, %c0_i32_1 : i32, i32, i32, i32
  }
  func.func @transform_4(%arg0: i32, %arg1: i32) -> (i32, i32, i32) {
    %c0_i32 = arith.constant 0 : i32
    %c0_i32_0 = arith.constant 0 : i32
    %c0_i32_1 = arith.constant 0 : i32
    return %arg1, %c0_i32, %c0_i32_0 : i32, i32, i32
  }
  func.func @transform_5(%arg0: i32, %arg1: i32) -> (i32, i32, i32) {
    %c0_i32 = arith.constant 0 : i32
    %c0_i32_0 = arith.constant 0 : i32
    %c0_i32_1 = arith.constant 0 : i32
    return %arg1, %c0_i32, %c0_i32_0 : i32, i32, i32
  }
  func.func @transform_6(%arg0: i32, %arg1: i32) -> (i32, i32, i32) {
    %c0_i32 = arith.constant 0 : i32
    %c0_i32_0 = arith.constant 0 : i32
    %c0_i32_1 = arith.constant 0 : i32
    return %arg1, %c0_i32, %c0_i32_0 : i32, i32, i32
  }
  func.func @transform_7(%arg0: i32, %arg1: i32) -> (i32, i32, i32) {
    %c0_i32 = arith.constant 0 : i32
    %c0_i32_0 = arith.constant 0 : i32
    %c0_i32_1 = arith.constant 0 : i32
    return %arg1, %c0_i32, %c0_i32_0 : i32, i32, i32
  }
  func.func @transform_8(%arg0: i32, %arg1: i32) -> (i32, i32, i32) {
    %c0_i32 = arith.constant 0 : i32
    %c0_i32_0 = arith.constant 0 : i32
    %c0_i32_1 = arith.constant 0 : i32
    return %arg1, %c0_i32, %c0_i32_0 : i32, i32, i32
  }
  func.func @transform_9(%arg0: i32, %arg1: i32) -> (i32, i32, i32) {
    %c0_i32 = arith.constant 0 : i32
    %c0_i32_0 = arith.constant 0 : i32
    %c0_i32_1 = arith.constant 0 : i32
    return %arg1, %c0_i32, %c0_i32_0 : i32, i32, i32
  }
  func.func @transform_10(%arg0: i32, %arg1: i32) -> (i32, i32, i32) {
    %c0_i32 = arith.constant 0 : i32
    %c0_i32_0 = arith.constant 0 : i32
    %c0_i32_1 = arith.constant 0 : i32
    return %arg1, %c0_i32, %c0_i32_0 : i32, i32, i32
  }
  func.func @transform_11(%arg0: i32, %arg1: i32) -> (i32, i32, i32) {
    %c0_i32 = arith.constant 0 : i32
    %c0_i32_0 = arith.constant 0 : i32
    %c0_i32_1 = arith.constant 0 : i32
    return %arg1, %c0_i32, %c0_i32_0 : i32, i32, i32
  }
  func.func @transform_12(%arg0: i32, %arg1: i32) -> (i32, i32, i32) {
    %c0_i32 = arith.constant 0 : i32
    %c0_i32_0 = arith.constant 0 : i32
    %c0_i32_1 = arith.constant 0 : i32
    return %arg1, %c0_i32, %c0_i32_0 : i32, i32, i32
  }
  func.func @transform_13(%arg0: i32, %arg1: i32) -> (i32, i32, i32) {
    %c0_i32 = arith.constant 0 : i32
    %c0_i32_0 = arith.constant 0 : i32
    %c0_i32_1 = arith.constant 0 : i32
    return %arg0, %c0_i32, %c0_i32_0 : i32, i32, i32
  }
}

</mosaic_0001>

<bundles_post_ra>
// kernel: tpu_custom_call.1
= control target key start
LH: loop header
LB: loop body
LE: loop exit
PB: predicated region body
PF: predicated region fallthrough
CT: control target
= control target key end

     0   :  { %s5382_s0 = inlined_call_operand.vmem [shape: f32[2,8,128], index: 0, kind: input, shape index: {}]   ;;  %s5383_s1 = inlined_call_operand.vmem [shape: bf16[2,12,128,32], index: 1, kind: input, shape index: {}]   ;;  %s5384_s2 = inlined_call_operand.vmem [shape: f32[2,12,1,32], index: 2, kind: input, shape index: {}]   ;;  %s5385_s3 = inlined_call_operand.vmem [shape: bf16[2,4,32,128], index: 3, kind: input, shape index: {}]   ;;  %s5386_s4 = inlined_call_operand.vmem [shape: f32[2,1,128], index: 4, kind: input, shape index: {}]   ;;  %s5387_s5 = inlined_call_operand.vmem [shape: f32[2,1,128], index: 5, kind: input, shape index: {}]   ;;  %s5388_s6 = inlined_call_operand.vmem [shape: f32[2,1,128], index: 6, kind: input, shape index: {}]   ;;  %s5389_s7 = inlined_call_operand.vmem [shape: bf16[2,128,512], index: 7, kind: input, shape index: {}]   ;;  %s5390_s8 = inlined_call_operand.vmem [shape: f32[2,1,512], index: 8, kind: input, shape index: {}]   ;;  %s5391_s9 = inlined_call_operand.vmem [shape: bf16[2,512,128], index: 9, kind: input, shape index: {}]   ;;  %s5392_s10 = inlined_call_operand.vmem [shape: f32[2,1,128], index: 10, kind: input, shape index: {}]   ;;  %s5393_s11 = inlined_call_operand.vmem [shape: f32[2,1,128], index: 11, kind: input, shape index: {}]   ;;  %s5394_s12 = inlined_call_operand.vmem [shape: f32[2,1,128], index: 12, kind: input, shape index: {}]   ;;  %s5395_s13 = inlined_call_operand.hbm [shape: f32[2,8,128], index: 13, kind: output, shape index: {}]  }
   0x1   :  { %5411 = sst [smem:[#allocation18_spill]] %s5382_s0 }
   0x2   :  { %5412 = sst [smem:[#allocation19_spill]] %s5383_s1 }
   0x3   :  { %5413 = sst [smem:[#allocation20_spill]] %s5384_s2 }
   0x4   :  { %5414 = sst [smem:[#allocation21_spill]] %s5385_s3 }
   0x5   :  { %5415 = sst [smem:[#allocation22_spill]] %s5388_s6 }
   0x6   :  { %5416 = sst [smem:[#allocation23_spill]] %s5389_s7 }
   0x7   :  { %5417 = sst [smem:[#allocation24_spill]] %s5394_s12 }
   0x8   :  { %5418 = sst [smem:[#allocation25_spill]] %s5395_s13 }
   0x9   :  { %18 = vsyncpa [#allocation3], 0 }
   0xa   :  { %20 = vsyncpa [#allocation3 + $0x1], 0  ;;  %s4759_s25 = smov 0   ;;  %s4761_s26 = smov 0  }
   0xb   :  { %s4763_s27 = smov 0   ;;  %s4765_s28 = smov 0  }
   0xc   :  { %s4767_s29 = smov 0   ;;  %s4769_s30 = smov 0  }
   0xd   :  { %s4771_s14 = smov 0   ;;  %s4773_s15 = smov 0  }
   0xe LB: > { %5419 = sst [smem:[#allocation5_spill]] %s4655_s25  ;;  %s3589_s16 = sadd.s32 4294967295, %s4683_s15   ;;  %s4683_s15 = sphi %s4773_s15, %s26_s15   ;;  %s4679_s14 = sphi %s4771_s14, %s5461_s14   ;;  %s4675_s30 = sphi %s4769_s30, %s5460_s30   ;;  %s4671_s29 = sphi %s4767_s29, %s5459_s29   ;;  %s4667_s28 = sphi %s4765_s28, %s5458_s28   ;;  %s4663_s27 = sphi %s4763_s27, %s5457_s27   ;;  %s4659_s26 = sphi %s4761_s26, %s5456_s26   ;;  %s4655_s25 = sphi %s4759_s25, %s5455_s25  }
   0xf   : > { %5420 = sst [smem:[#allocation6_spill]] %s4659_s26  ;;  %s3590_s17 = sadd.s32 4294967294, %s4683_s15  }
  0x10   : > { %5421 = sst [smem:[#allocation7_spill]] %s4663_s27  ;;  %s35_s18 = sadd.s32 1, %s4675_s30 }
  0x11   : > { %5422 = sst [smem:[#allocation8_spill]] %s4667_s28  ;;  %p36_p0 = scmp.ge.s32.totalorder %s35_s18, 2 }
  0x12   : > { %5423 = sst [smem:[#allocation9_spill]] %s4671_s29  ;;  %s38_s19 = sadd.s32 1, %s4679_s14 }
  0x13   : > { %5424 = sst [smem:[#allocation10_spill]] %s4675_s30  ;;  %p393_p1 = scmp.ne.s32.totalorder %s4663_s27, %s4659_s26 }
  0x14   : > { %5425 = sst [smem:[#allocation11_spill]] %s4679_s14  ;;  %p394_p2 = scmp.eq.s32.totalorder %s3589_s16, 3 }
  0x15   : > { %5426 = sst [smem:[#allocation12_spill]] %s4683_s15  ;;  %s5463_s18 = smov (%p36_p0, %s35_s18), 0 }
  0x16   : > { %5427 = sst [smem:[#allocation13_spill]] %s5463_s18  ;;  %s5465_s19 = smov (!%p36_p0, %s38_s19), %s4679_s14 }
  0x17   : > { %p4808_p3 = por %p394_p2, %p393_p1  ;;  %p399_p4 = scmp.ne.s32.totalorder %s4659_s26, %s4655_s25 }
  0x18   : > { %p40_p5 = scmp.ge.s32.totalorder %s5465_s19, 2  ;;  %p400_p6 = scmp.eq.s32.totalorder %s3590_s17, 3 }
  0x19   : > { %s5428_s20 = scalar_select %p4808_p3, 1, 0 }
  0x1a   : > { %p3593_p7 = scmp.ge.s32.totalorder %s4683_s15, 1  ;;  %p507_p8 = scmp.lt.s32.totalorder %s4683_s15, 5 }
  0x1b   : > { %5429 = sst [smem:[#allocation14_spill]] %s5428_s20  ;;  %s5467_s19 = smov (%p40_p5, %s5465_s19), 0 }
  0x1c   : > { %5430 = sst [smem:[#allocation15_spill]] %s5467_s19  ;;  %p4818_p9 = por %p400_p6, %p399_p4 }
  0x1d   : > { %p508_p10 = pnand %p3593_p7, %p507_p8  ;;  %s380_s22 = ssub.s32 %s4679_s14, %s5467_s19 }
  0x1e   : > { %s5431_s21 = scalar_select %p4818_p9, 1, 0 }
  0x1f   : > { %s383_s23 = sadd.s32 1, %s4663_s27  ;;  %p381_p11 = scmp.eq.s32.totalorder %s380_s22, 0 }
  0x20   : > { %5432 = sst [smem:[#allocation16_spill]] %s5431_s21  ;;  %511 = sbr.rel (%p508_p10) target bundleno = 2339 (0x923), region = 72 }
  0x21   : > { %s4826_s24 = scalar_select %p381_p11, %s4663_s27, %s383_s23  }
  0x22   : > { %s5399_s16 = sand.u32 (!%p508_p10), 1, %s4659_s26   ;;  %p596_p12 = scmp.lt.s32.totalorder (!%p508_p10), %s4671_s29, 1 }
  0x23   : > { %5433 = sst [smem:[#allocation17_spill]] %s4826_s24  ;;  %s3594_s17 = sshll.u32 (!%p508_p10), %s5399_s16, 3 }
  0x24   : > { %p600_p13 = scmp.lt.s32.totalorder (!%p508_p10), %s4667_s28, 1  ;;  %s5434_s0 = sld [smem:[#allocation18_spill]] (!%p508_p10) }
  0x25   : > { %s597_s18 = scalar_select %p596_p12, %s4671_s29, 1 }
  0x26   : > { %s4835_s30 = scalar_select %p600_p13, %s4667_s28, 1 }
  0x27   : > { %s3595_s22 = sshll.u32 %s597_s18, 3  ;;  %s5435_s1 = sld [smem:[#allocation19_spill]] }
  0x28   : > { %s4310_s16 = smul.u32 768, %s4835_s30  ;;  %s3807_s27 = sshll.u32 %s4835_s30, 6 }
  0x29   : > { %s4311_s24 = smul.u32 12, %s4835_s30  ;;  %s5436_s3 = sld [smem:[#allocation21_spill]] }
  0x2a   : > { %s599_s14 = scalar_lea.vmem %s5434_s0, %s3595_s22  ;;  %s5437_s2 = sld [smem:[#allocation20_spill]] }
  0x2b   : > { %s3808_s13 = sshll.u32 %s4835_s30, 8  ;;  %s5439_s7 = sld [smem:[#allocation23_spill]] }
  0x2c   : > { %s4885_s12 = scalar_lea.vmem %s5391_s9, %s3808_s13 }
  0x2d   : > { %s4846_s15 = scalar_lea.vmem %s5435_s1, %s4310_s16  ;;  %s639_s16 = scalar_lea.vmem %s5392_s10, %s4835_s30 }
  0x2f   : > { %s4851_s26 = scalar_lea.vmem %s5436_s3, %s3807_s27  ;;  %s3601_s27 = sshll.u32 %s4835_s30, 2 }
  0x30   : > { %s4856_s19 = scalar_lea.vmem %s5437_s2, %s4311_s24  ;;  %s4880_s22 = scalar_lea.vmem %s5390_s8, %s3601_s27 }
  0x31   : > { %s4875_s29 = scalar_lea.vmem %s5439_s7, %s3808_s13  ;;  %s642_s3 = scalar_lea.vmem %s5393_s11, %s4835_s30 }
  0x32   : > { %s5440_s7 = sld [smem:[#allocation24_spill]]  ;;  %s4899_s24 = scalar_lea.vmem [#allocation2], %s3594_s17 }
  0x33   : > { %s5441_s27 = sld [smem:[#allocation8_spill]] }
  0x38   : > { %s645_s6 = scalar_lea.vmem %s5440_s7, %s4835_s30 }
  0x39   : > { %p3604_p0 = scmp.ne.s32.totalorder %s5441_s27, 0 }
  0x3b   : > { %650 = sbr.rel (%p3604_p0) target bundleno = 66 (0x42), region = 76 }
  0x40   : > { %v651_v0 = vld [vmem:[%s599_s14] sm:$0xff] }
  0x41   : > { %652 = vst [vmem:[%s4899_s24] sm:$0xff] %v651_v0 }
  0x42 PF: > { %v4386_v1 = vld [vmem:[%s4846_s15 + $0x38] sm:$0xff]   ;;  %v4685_v2 = vmov 0.0   ;;  %v4388_v4 = vld [vmem:[%s4846_s15 + $0x30] sm:$0xff]   ;;  %vm4686_vm0 = vmmov 0   ;;  %v4390_v6 = vld [vmem:[%s4846_s15 + $0x28] sm:$0xff]   ;;  %vm1995_vm1 = vcmask 261120   ;;  %s5442_s2 = scalar_lea.vmem %s5386_s4, %s4835_s30  ;;  %s5443_s14 = scalar_lea.vmem %s5387_s5, %s4835_s30 }
  0x43   : > { %3990 = vmatprep.subr.bf16.mxu0 %v4685_v2  ;;  %4010 = vmatprep.subr.bf16.mxu1 %v4685_v2  ;;  %v4387_v3 = vld [vmem:[%s4846_s15 + $0x78] sm:$0xff]   ;;  %v4389_v5 = vld [vmem:[%s4846_s15 + $0x70] sm:$0xff]   ;;  %v4391_v7 = vld [vmem:[%s4846_s15 + $0x68] sm:$0xff]   ;;  %vm2240_vm2 = vcmask 1043456   ;;  %vm2184_vm3 = vcmask 64512   ;;  %s5446_s18 = sld [smem:[#allocation9_spill]] }
  0x44   : > { %3991 = vmatpush3.bf16.msra.mxu0 %v4386_v1  ;;  %4006 = vmatprep.mubr.msk.bf16.mxu0 %vm4686_vm0, %v4685_v2  ;;  %v4392_v8 = vld [vmem:[%s4846_s15 + $0x20] sm:$0xff]   ;;  %v4394_v10 = vld [vmem:[%s4846_s15 + $0x18] sm:$0xff]   ;;  %v4396_v12 = vld [vmem:[%s4846_s15 + $0x10] sm:$0xff]   ;;  %s3393_s0 = sshll.u32 %s4899_s24, 4  ;;  %s5450_s7 = sld [smem:[#allocation25_spill]]  ;;  %s3394_s0 = int_to_ptr.vmem [resolvable:$true] %s3393_s0 }
  0x45   : > { %4011 = vmatpush3.bf16.msra.mxu1 %v4387_v3  ;;  %3992 = vmatprep.subr.bf16.mxu0 %v4685_v2  ;;  %v4393_v9 = vld [vmem:[%s4846_s15 + $0x60] sm:$0xff]   ;;  %v4395_v11 = vld [vmem:[%s4846_s15 + $0x58] sm:$0xff]   ;;  %v4397_v13 = vld [vmem:[%s4846_s15 + $0x50] sm:$0xff]   ;;  %s4591_s17 = scalar_lea.vmem %s3394_s0, 128 }
  0x46   : > { %4012 = vmatprep.subr.bf16.mxu1 %v4685_v2  ;;  %4026 = vmatprep.mubr.msk.bf16.mxu1 %vm4686_vm0, %v4685_v2  ;;  %v4398_v14 = vld [vmem:[%s4846_s15 + $0x8] sm:$0xff]   ;;  %v4400_v16 = vld [vmem:[%s4846_s15] sm:$0xff]   ;;  %v4402_v20 = vld [vmem:[%s4846_s15 + $0xb8] sm:$0xff]   ;;  %p4592_p1 = scmp.ne.s32.totalorder %s3394_s0, %s4591_s17 }
  0x47   : > { %v4399_v15 = vld [vmem:[%s4846_s15 + $0x48] sm:$0xff]   ;;  %v4401_v18 = vld [vmem:[%s4846_s15 + $0x40] sm:$0xff]   ;;  %v4403_v21 = vld [vmem:[%s4846_s15 + $0xf8] sm:$0xff]  }
  0x48   : > { %3993 = vmatpush3.bf16.msra.mxu0 %v4388_v4  ;;  %v653_v17 = vld [vmem:[%s4899_s24] sm:$0xff]  ;;  %v4404_v22 = vld [vmem:[%s4846_s15 + $0xb0] sm:$0xff]   ;;  %v4410_v28 = vld [vmem:[%s4846_s15 + $0x98] sm:$0xff]   ;;  %p4593_p2 = pnand %p4592_p1, %p4808_p3 }
  0x49   : > { %4013 = vmatpush3.bf16.msra.mxu1 %v4389_v5  ;;  %3994 = vmatprep.subr.bf16.mxu0 %v4685_v2  ;;  %v4940_v19 = vpack.c.bf16 %v653_v17, %v653_v17  ;;  %v4405_v23 = vld [vmem:[%s4846_s15 + $0xf0] sm:$0xff]   ;;  %v4406_v24 = vld [vmem:[%s4846_s15 + $0xa8] sm:$0xff]   ;;  %v4408_v26 = vld [vmem:[%s4846_s15 + $0xa0] sm:$0xff]   ;;  %s3804_s27 = sshll.u32 %s5446_s18, 7 }
  0x4a   : > { %4014 = vmatprep.subr.bf16.mxu1 %v4685_v2  ;;  %v4407_v25 = vld [vmem:[%s4846_s15 + $0xe8] sm:$0xff]   ;;  %v4409_v27 = vld [vmem:[%s4846_s15 + $0xe0] sm:$0xff]   ;;  %v4411_v29 = vld [vmem:[%s4846_s15 + $0xd8] sm:$0xff]   ;;  %p4594_p4 = pneg %p4593_p2 }
  0x4b   : > { %v4412_v30 = vld [vmem:[%s4846_s15 + $0x90] sm:$0xff]   ;;  %v4414_v32 = vld [vmem:[%s4846_s15 + $0x88] sm:$0xff]   ;;  %v4416_v34 = vld [vmem:[%s4846_s15 + $0x80] sm:$0xff]  }
  0x4c   : > { %3995 = vmatpush3.bf16.msra.mxu0 %v4390_v6  ;;  %v4413_v31 = vld [vmem:[%s4846_s15 + $0xd0] sm:$0xff]   ;;  %v4415_v33 = vld [vmem:[%s4846_s15 + $0xc8] sm:$0xff]   ;;  %v4417_v35 = vld [vmem:[%s4846_s15 + $0xc0] sm:$0xff]  }
  0x4d   : > { %4015 = vmatpush3.bf16.msra.mxu1 %v4391_v7  ;;  %3996 = vmatprep.subr.bf16.mxu0 %v4685_v2  ;;  %v4418_v36 = vld [vmem:[%s4846_s15 + $0x138] sm:$0xff]   ;;  %v4420_v38 = vld [vmem:[%s4846_s15 + $0x130] sm:$0xff]   ;;  %v4422_v40 = vld [vmem:[%s4846_s15 + $0x128] sm:$0xff]  }
  0x4e   : > { %4016 = vmatprep.subr.bf16.mxu1 %v4685_v2  ;;  %v4419_v37 = vld [vmem:[%s4846_s15 + $0x178] sm:$0xff]   ;;  %v4421_v39 = vld [vmem:[%s4846_s15 + $0x170] sm:$0xff]   ;;  %v4423_v41 = vld [vmem:[%s4846_s15 + $0x168] sm:$0xff]  }
  0x4f   : > { %v4424_v42 = vld [vmem:[%s4846_s15 + $0x120] sm:$0xff]   ;;  %v4426_v44 = vld [vmem:[%s4846_s15 + $0x118] sm:$0xff]   ;;  %v4428_v46 = vld [vmem:[%s4846_s15 + $0x110] sm:$0xff]  }
  0x50   : > { %3997 = vmatpush3.bf16.msra.mxu0 %v4392_v8  ;;  %v4425_v43 = vld [vmem:[%s4846_s15 + $0x160] sm:$0xff]   ;;  %v4427_v45 = vld [vmem:[%s4846_s15 + $0x158] sm:$0xff]   ;;  %v4429_v47 = vld [vmem:[%s4846_s15 + $0x150] sm:$0xff]  }
  0x51   : > { %4017 = vmatpush3.bf16.msra.mxu1 %v4393_v9  ;;  %3998 = vmatprep.subr.bf16.mxu0 %v4685_v2  ;;  %v4430_v48 = vld [vmem:[%s4846_s15 + $0x108] sm:$0xff]   ;;  %v4432_v50 = vld [vmem:[%s4846_s15 + $0x100] sm:$0xff]   ;;  %v4434_v52 = vld [vmem:[%s4846_s15 + $0x1b8] sm:$0xff]  }
  0x52   : > { %4018 = vmatprep.subr.bf16.mxu1 %v4685_v2  ;;  %v4431_v49 = vld [vmem:[%s4846_s15 + $0x148] sm:$0xff]   ;;  %v4433_v51 = vld [vmem:[%s4846_s15 + $0x140] sm:$0xff]   ;;  %v4435_v53 = vld [vmem:[%s4846_s15 + $0x1f8] sm:$0xff]  }
  0x53   : > { %v4436_v54 = vld [vmem:[%s4846_s15 + $0x1b0] sm:$0xff]   ;;  %v4438_v56 = vld [vmem:[%s4846_s15 + $0x1a8] sm:$0xff]   ;;  %v4440_v58 = vld [vmem:[%s4846_s15 + $0x1a0] sm:$0xff]  }
  0x54   : > { %3999 = vmatpush3.bf16.msra.mxu0 %v4394_v10  ;;  %v4437_v55 = vld [vmem:[%s4846_s15 + $0x1f0] sm:$0xff]   ;;  %v4439_v57 = vld [vmem:[%s4846_s15 + $0x1e8] sm:$0xff]   ;;  %v4441_v59 = vld [vmem:[%s4846_s15 + $0x1e0] sm:$0xff]  }
  0x55   : > { %4019 = vmatpush3.bf16.msra.mxu1 %v4395_v11  ;;  %4000 = vmatprep.subr.bf16.mxu0 %v4685_v2  ;;  %v4442_v60 = vld [vmem:[%s4846_s15 + $0x198] sm:$0xff]   ;;  %v4444_v62 = vld [vmem:[%s4846_s15 + $0x190] sm:$0xff]   ;;  %v4446_v0 = vld [vmem:[%s4846_s15 + $0x188] sm:$0xff]  }
  0x56   : > { %4020 = vmatprep.subr.bf16.mxu1 %v4685_v2  ;;  %v4443_v61 = vld [vmem:[%s4846_s15 + $0x1d8] sm:$0xff]   ;;  %v4445_v63 = vld [vmem:[%s4846_s15 + $0x1d0] sm:$0xff]   ;;  %v4447_v1 = vld [vmem:[%s4846_s15 + $0x1c8] sm:$0xff]  }
  0x57   : > { %v4448_v3 = vld [vmem:[%s4846_s15 + $0x180] sm:$0xff]   ;;  %v4450_v5 = vld [vmem:[%s4846_s15 + $0x238] sm:$0xff]   ;;  %v4452_v7 = vld [vmem:[%s4846_s15 + $0x230] sm:$0xff]  }
  0x58   : > { %4001 = vmatpush3.bf16.msra.mxu0 %v4396_v12  ;;  %v4449_v4 = vld [vmem:[%s4846_s15 + $0x1c0] sm:$0xff]   ;;  %v4451_v6 = vld [vmem:[%s4846_s15 + $0x278] sm:$0xff]   ;;  %v4453_v8 = vld [vmem:[%s4846_s15 + $0x270] sm:$0xff]  }
  0x59   : > { %4021 = vmatpush3.bf16.msra.mxu1 %v4397_v13  ;;  %4002 = vmatprep.subr.bf16.mxu0 %v4685_v2  ;;  %v4454_v9 = vld [vmem:[%s4846_s15 + $0x228] sm:$0xff]   ;;  %v4456_v11 = vld [vmem:[%s4846_s15 + $0x220] sm:$0xff]   ;;  %v4458_v13 = vld [vmem:[%s4846_s15 + $0x218] sm:$0xff]  }
  0x5a   : > { %4022 = vmatprep.subr.bf16.mxu1 %v4685_v2  ;;  %v4455_v10 = vld [vmem:[%s4846_s15 + $0x268] sm:$0xff]   ;;  %v4457_v12 = vld [vmem:[%s4846_s15 + $0x260] sm:$0xff]  }
  0x5b   : > { %v4462_v17 = vld [vmem:[%s4846_s15 + $0x208] sm:$0xff]  }
  0x5c   : > { %4003 = vmatpush3.bf16.msra.mxu0 %v4398_v14  ;;  %v4459_v14 = vld [vmem:[%s4846_s15 + $0x258] sm:$0xff]  }
  0x5d   : > { %4023 = vmatpush3.bf16.msra.mxu1 %v4399_v15  ;;  %4004 = vmatprep.subr.bf16.mxu0 %v4685_v2  ;;  %v4460_v15 = vld [vmem:[%s4846_s15 + $0x210] sm:$0xff]  }
  0x5e   : > { %4024 = vmatprep.subr.bf16.mxu1 %v4685_v2 }
  0x60   : > { %4005 = vmatpush3.bf16.msra.mxu0 %v4400_v16  ;;  %v4461_v16 = vld [vmem:[%s4846_s15 + $0x250] sm:$0xff]  }
  0x61   : > { %4025 = vmatpush3.bf16.msra.mxu1 %v4401_v18  ;;  %4030 = vmatprep.subr.bf16.mxu0 %v4685_v2  ;;  %v4463_v18 = vld [vmem:[%s4846_s15 + $0x248] sm:$0xff]  }
  0x62   : > { %4050 = vmatprep.subr.bf16.mxu1 %v4685_v2 }
  0x63   : > { %4007 = vmatmul.mubr.bf16.vlgmr.msra.gmra.mxu0 %v4940_v19 }
  0x64   : > { %4027 = vmatmul.mubr.bf16.vlgmr.msra.gmra.mxu1 %v4940_v19  ;;  %4031 = vmatpush3.bf16.msra.mxu0 %v4402_v20  ;;  %v4464_v20 = vld [vmem:[%s4846_s15 + $0x200] sm:$0xff]  }
  0x65   : > { %4051 = vmatpush3.bf16.msra.mxu1 %v4403_v21  ;;  %4032 = vmatprep.subr.bf16.mxu0 %v4685_v2  ;;  %v4465_v21 = vld [vmem:[%s4846_s15 + $0x240] sm:$0xff]  }
  0x66   : > { %4052 = vmatprep.subr.bf16.mxu1 %v4685_v2  ;;  %4046 = vmatprep.mubr.msk.bf16.mxu0 %vm4686_vm0, %v4685_v2 }
  0x67   : > { %4066 = vmatprep.mubr.msk.bf16.mxu1 %vm4686_vm0, %v4685_v2 }
  0x68   : > { %4033 = vmatpush3.bf16.msra.mxu0 %v4404_v22  ;;  %v4466_v22 = vld [vmem:[%s4846_s15 + $0x2b8] sm:$0xff]  }
  0x69   : > { %4053 = vmatpush3.bf16.msra.mxu1 %v4405_v23  ;;  %4034 = vmatprep.subr.bf16.mxu0 %v4685_v2  ;;  %v4467_v23 = vld [vmem:[%s4846_s15 + $0x2f8] sm:$0xff]  }
  0x6a   : > { %4054 = vmatprep.subr.bf16.mxu1 %v4685_v2 }
  0x6c   : > { %4035 = vmatpush3.bf16.msra.mxu0 %v4406_v24  ;;  %v4468_v24 = vld [vmem:[%s4846_s15 + $0x2b0] sm:$0xff]  }
  0x6d   : > { %4055 = vmatpush3.bf16.msra.mxu1 %v4407_v25  ;;  %4036 = vmatprep.subr.bf16.mxu0 %v4685_v2  ;;  %v4469_v25 = vld [vmem:[%s4846_s15 + $0x2f0] sm:$0xff]  }
  0x6e   : > { %4056 = vmatprep.subr.bf16.mxu1 %v4685_v2 }
  0x70   : > { %4037 = vmatpush3.bf16.msra.mxu0 %v4408_v26  ;;  %v4470_v26 = vld [vmem:[%s4846_s15 + $0x2a8] sm:$0xff]  }
  0x71   : > { %4057 = vmatpush3.bf16.msra.mxu1 %v4409_v27  ;;  %4038 = vmatprep.subr.bf16.mxu0 %v4685_v2  ;;  %v4471_v27 = vld [vmem:[%s4846_s15 + $0x2e8] sm:$0xff]  }
  0x72   : > { %4058 = vmatprep.subr.bf16.mxu1 %v4685_v2 }
  0x74   : > { %4039 = vmatpush3.bf16.msra.mxu0 %v4410_v28  ;;  %v4472_v28 = vld [vmem:[%s4846_s15 + $0x2a0] sm:$0xff]  }
  0x75   : > { %4059 = vmatpush3.bf16.msra.mxu1 %v4411_v29  ;;  %4040 = vmatprep.subr.bf16.mxu0 %v4685_v2  ;;  %v4473_v29 = vld [vmem:[%s4846_s15 + $0x2e0] sm:$0xff]  }
  0x76   : > { %4060 = vmatprep.subr.bf16.mxu1 %v4685_v2 }
  0x78   : > { %4041 = vmatpush3.bf16.msra.mxu0 %v4412_v30  ;;  %v4474_v30 = vld [vmem:[%s4846_s15 + $0x298] sm:$0xff]  }
  0x79   : > { %4061 = vmatpush3.bf16.msra.mxu1 %v4413_v31  ;;  %4042 = vmatprep.subr.bf16.mxu0 %v4685_v2  ;;  %v4475_v31 = vld [vmem:[%s4846_s15 + $0x2d8] sm:$0xff]  }
  0x7a   : > { %4062 = vmatprep.subr.bf16.mxu1 %v4685_v2 }
  0x7c   : > { %4043 = vmatpush3.bf16.msra.mxu0 %v4414_v32  ;;  %v4476_v32 = vld [vmem:[%s4846_s15 + $0x290] sm:$0xff]  }
  0x7d   : > { %4063 = vmatpush3.bf16.msra.mxu1 %v4415_v33  ;;  %4044 = vmatprep.subr.bf16.mxu0 %v4685_v2  ;;  %v4477_v33 = vld [vmem:[%s4846_s15 + $0x2d0] sm:$0xff]  }
  0x7e   : > { %4064 = vmatprep.subr.bf16.mxu1 %v4685_v2 }
  0x80   : > { %4045 = vmatpush3.bf16.msra.mxu0 %v4416_v34  ;;  %v4478_v34 = vld [vmem:[%s4846_s15 + $0x288] sm:$0xff]  }
  0x81   : > { %4065 = vmatpush3.bf16.msra.mxu1 %v4417_v35  ;;  %4070 = vmatprep.subr.bf16.mxu0 %v4685_v2  ;;  %v4479_v35 = vld [vmem:[%s4846_s15 + $0x2c8] sm:$0xff]  }
  0x82   : > { %4090 = vmatprep.subr.bf16.mxu1 %v4685_v2 }
  0x83   : > { %4047 = vmatmul.mubr.bf16.vlgmr.msra.gmra.mxu0 %v4940_v19 }
  0x84   : > { %4067 = vmatmul.mubr.bf16.vlgmr.msra.gmra.mxu1 %v4940_v19  ;;  %4071 = vmatpush3.bf16.msra.mxu0 %v4418_v36  ;;  %v4480_v36 = vld [vmem:[%s4846_s15 + $0x280] sm:$0xff]  }
  0x85   : > { %4091 = vmatpush3.bf16.msra.mxu1 %v4419_v37  ;;  %4072 = vmatprep.subr.bf16.mxu0 %v4685_v2  ;;  %v4481_v37 = vld [vmem:[%s4846_s15 + $0x2c0] sm:$0xff]  }
  0x86   : > { %4092 = vmatprep.subr.bf16.mxu1 %v4685_v2  ;;  %4086 = vmatprep.mubr.msk.bf16.mxu0 %vm4686_vm0, %v4685_v2 }
  0x87   : > { %4106 = vmatprep.mubr.msk.bf16.mxu1 %vm4686_vm0, %v4685_v2 }
  0x88   : > { %4073 = vmatpush3.bf16.msra.mxu0 %v4420_v38 }
  0x89   : > { %4093 = vmatpush3.bf16.msra.mxu1 %v4421_v39  ;;  %4074 = vmatprep.subr.bf16.mxu0 %v4685_v2 }
  0x8a   : > { %4094 = vmatprep.subr.bf16.mxu1 %v4685_v2 }
  0x8c   : > { %4075 = vmatpush3.bf16.msra.mxu0 %v4422_v40 }
  0x8d   : > { %4095 = vmatpush3.bf16.msra.mxu1 %v4423_v41  ;;  %4076 = vmatprep.subr.bf16.mxu0 %v4685_v2 }
  0x8e   : > { %4096 = vmatprep.subr.bf16.mxu1 %v4685_v2 }
  0x90   : > { %4077 = vmatpush3.bf16.msra.mxu0 %v4424_v42 }
  0x91   : > { %4097 = vmatpush3.bf16.msra.mxu1 %v4425_v43  ;;  %4078 = vmatprep.subr.bf16.mxu0 %v4685_v2 }
  0x92   : > { %4098 = vmatprep.subr.bf16.mxu1 %v4685_v2 }
  0x94   : > { %4079 = vmatpush3.bf16.msra.mxu0 %v4426_v44 }
  0x95   : > { %4099 = vmatpush3.bf16.msra.mxu1 %v4427_v45  ;;  %4080 = vmatprep.subr.bf16.mxu0 %v4685_v2 }
  0x96   : > { %4100 = vmatprep.subr.bf16.mxu1 %v4685_v2 }
  0x98   : > { %4081 = vmatpush3.bf16.msra.mxu0 %v4428_v46 }
  0x99   : > { %4101 = vmatpush3.bf16.msra.mxu1 %v4429_v47  ;;  %4082 = vmatprep.subr.bf16.mxu0 %v4685_v2 }
  0x9a   : > { %4102 = vmatprep.subr.bf16.mxu1 %v4685_v2 }
  0x9c   : > { %4083 = vmatpush3.bf16.msra.mxu0 %v4430_v48 }
  0x9d   : > { %4103 = vmatpush3.bf16.msra.mxu1 %v4431_v49  ;;  %4084 = vmatprep.subr.bf16.mxu0 %v4685_v2 }
  0x9e   : > { %4104 = vmatprep.subr.bf16.mxu1 %v4685_v2 }
  0xa0   : > { %4085 = vmatpush3.bf16.msra.mxu0 %v4432_v50 }
  0xa1   : > { %4105 = vmatpush3.bf16.msra.mxu1 %v4433_v51  ;;  %4110 = vmatprep.subr.bf16.mxu0 %v4685_v2 }
  0xa2   : > { %4130 = vmatprep.subr.bf16.mxu1 %v4685_v2 }
  0xa3   : > { %4087 = vmatmul.mubr.bf16.vlgmr.msra.gmra.mxu0 %v4940_v19 }
  0xa4   : > { %4107 = vmatmul.mubr.bf16.vlgmr.msra.gmra.mxu1 %v4940_v19  ;;  %4111 = vmatpush3.bf16.msra.mxu0 %v4434_v52 }
  0xa5   : > { %4131 = vmatpush3.bf16.msra.mxu1 %v4435_v53  ;;  %4112 = vmatprep.subr.bf16.mxu0 %v4685_v2  ;;  %v3609_v53 = vld [vmem:[%s4856_s19 + $0x4] ss:$0 sm:$0xff] }
  0xa6   : > { %4132 = vmatprep.subr.bf16.mxu1 %v4685_v2  ;;  %4126 = vmatprep.mubr.msk.bf16.mxu0 %vm4686_vm0, %v4685_v2 }
  0xa7   : > { %4146 = vmatprep.mubr.msk.bf16.mxu1 %vm4686_vm0, %v4685_v2 }
  0xa8   : > { %4113 = vmatpush3.bf16.msra.mxu0 %v4436_v54  ;;  %v3610_v54 = vld [vmem:[%s4856_s19 + $0x5] ss:$0 sm:$0xff] }
  0xa9   : > { %4133 = vmatpush3.bf16.msra.mxu1 %v4437_v55  ;;  %4114 = vmatprep.subr.bf16.mxu0 %v4685_v2 }
  0xaa   : > { %4134 = vmatprep.subr.bf16.mxu1 %v4685_v2 }
  0xac   : > { %4115 = vmatpush3.bf16.msra.mxu0 %v4438_v56 }
  0xad   : > { %4135 = vmatpush3.bf16.msra.mxu1 %v4439_v57  ;;  %4116 = vmatprep.subr.bf16.mxu0 %v4685_v2 }
  0xae   : > { %4136 = vmatprep.subr.bf16.mxu1 %v4685_v2 }
  0xb0   : > { %4117 = vmatpush3.bf16.msra.mxu0 %v4440_v58 }
  0xb1   : > { %4137 = vmatpush3.bf16.msra.mxu1 %v4441_v59  ;;  %4118 = vmatprep.subr.bf16.mxu0 %v4685_v2 }
  0xb2   : > { %4138 = vmatprep.subr.bf16.mxu1 %v4685_v2 }
  0xb4   : > { %4119 = vmatpush3.bf16.msra.mxu0 %v4442_v60 }
  0xb5   : > { %4139 = vmatpush3.bf16.msra.mxu1 %v4443_v61  ;;  %4120 = vmatprep.subr.bf16.mxu0 %v4685_v2 }
  0xb6   : > { %4140 = vmatprep.subr.bf16.mxu1 %v4685_v2 }
  0xb8   : > { %4121 = vmatpush3.bf16.msra.mxu0 %v4444_v62  ;;  %v3605_v62 = vld [vmem:[%s4856_s19] ss:$0 sm:$0xff] }
  0xb9   : > { %4141 = vmatpush3.bf16.msra.mxu1 %v4445_v63  ;;  %4122 = vmatprep.subr.bf16.mxu0 %v4685_v2 }
  0xba   : > { %4142 = vmatprep.subr.bf16.mxu1 %v4685_v2 }
  0xbc   : > { %4123 = vmatpush3.bf16.msra.mxu0 %v4446_v0 }
  0xbd   : > { %4143 = vmatpush3.bf16.msra.mxu1 %v4447_v1  ;;  %4124 = vmatprep.subr.bf16.mxu0 %v4685_v2  ;;  %v3606_v1 = vld [vmem:[%s4856_s19 + $0x1] ss:$0 sm:$0xff] }
  0xbe   : > { %4144 = vmatprep.subr.bf16.mxu1 %v4685_v2 }
  0xc0   : > { %4125 = vmatpush3.bf16.msra.mxu0 %v4448_v3 }
  0xc1   : > { %4145 = vmatpush3.bf16.msra.mxu1 %v4449_v4  ;;  %4150 = vmatprep.subr.bf16.mxu0 %v4685_v2 }
  0xc2   : > { %4170 = vmatprep.subr.bf16.mxu1 %v4685_v2 }
  0xc3   : > { %4127 = vmatmul.mubr.bf16.vlgmr.msra.gmra.mxu0 %v4940_v19 }
  0xc4   : > { %4147 = vmatmul.mubr.bf16.vlgmr.msra.gmra.mxu1 %v4940_v19  ;;  %4151 = vmatpush3.bf16.msra.mxu0 %v4450_v5 }
  0xc5   : > { %4171 = vmatpush3.bf16.msra.mxu1 %v4451_v6  ;;  %4152 = vmatprep.subr.bf16.mxu0 %v4685_v2 }
  0xc6   : > { %4172 = vmatprep.subr.bf16.mxu1 %v4685_v2  ;;  %4166 = vmatprep.mubr.msk.bf16.mxu0 %vm4686_vm0, %v4685_v2 }
  0xc7   : > { %4186 = vmatprep.mubr.msk.bf16.mxu1 %vm4686_vm0, %v4685_v2 }
  0xc8   : > { %4153 = vmatpush3.bf16.msra.mxu0 %v4452_v7 }
  0xc9   : > { %4173 = vmatpush3.bf16.msra.mxu1 %v4453_v8  ;;  %4154 = vmatprep.subr.bf16.mxu0 %v4685_v2 }
  0xca   : > { %4174 = vmatprep.subr.bf16.mxu1 %v4685_v2 }
  0xcc   : > { %4155 = vmatpush3.bf16.msra.mxu0 %v4454_v9 }
  0xcd   : > { %4175 = vmatpush3.bf16.msra.mxu1 %v4455_v10  ;;  %4156 = vmatprep.subr.bf16.mxu0 %v4685_v2 }
  0xce   : > { %4176 = vmatprep.subr.bf16.mxu1 %v4685_v2 }
  0xd0   : > { %4157 = vmatpush3.bf16.msra.mxu0 %v4456_v11 }
  0xd1   : > { %4177 = vmatpush3.bf16.msra.mxu1 %v4457_v12  ;;  %4158 = vmatprep.subr.bf16.mxu0 %v4685_v2  ;;  %v3611_v12 = vld [vmem:[%s4856_s19 + $0x6] ss:$0 sm:$0xff] }
  0xd2   : > { %4178 = vmatprep.subr.bf16.mxu1 %v4685_v2 }
  0xd4   : > { %4159 = vmatpush3.bf16.msra.mxu0 %v4458_v13  ;;  %v3612_v13 = vld [vmem:[%s4856_s19 + $0x7] ss:$0 sm:$0xff] }
  0xd5   : > { %4179 = vmatpush3.bf16.msra.mxu1 %v4459_v14  ;;  %4160 = vmatprep.subr.bf16.mxu0 %v4685_v2 }
  0xd6   : > { %4180 = vmatprep.subr.bf16.mxu1 %v4685_v2 }
  0xd8   : > { %4161 = vmatpush3.bf16.msra.mxu0 %v4460_v15 }
  0xd9   : > { %4181 = vmatpush3.bf16.msra.mxu1 %v4461_v16  ;;  %4162 = vmatprep.subr.bf16.mxu0 %v4685_v2 }
  0xda   : > { %4182 = vmatprep.subr.bf16.mxu1 %v4685_v2 }
  0xdc   : > { %4163 = vmatpush3.bf16.msra.mxu0 %v4462_v17 }
  0xdd   : > { %4183 = vmatpush3.bf16.msra.mxu1 %v4463_v18  ;;  %4164 = vmatprep.subr.bf16.mxu0 %v4685_v2 }
  0xde   : > { %4184 = vmatprep.subr.bf16.mxu1 %v4685_v2 }
  0xe0   : > { %4165 = vmatpush3.bf16.msra.mxu0 %v4464_v20 }
  0xe1   : > { %4185 = vmatpush3.bf16.msra.mxu1 %v4465_v21  ;;  %4190 = vmatprep.subr.bf16.mxu0 %v4685_v2 }
  0xe2   : > { %4210 = vmatprep.subr.bf16.mxu1 %v4685_v2 }
  0xe3   : > { %4167 = vmatmul.mubr.bf16.vlgmr.msra.gmra.mxu0 %v4940_v19 }
  0xe4   : > { %4187 = vmatmul.mubr.bf16.vlgmr.msra.gmra.mxu1 %v4940_v19  ;;  %4191 = vmatpush3.bf16.msra.mxu0 %v4466_v22  ;;  %v3607_v22 = vld [vmem:[%s4856_s19 + $0x2] ss:$0 sm:$0xff] }
  0xe5   : > { %4211 = vmatpush3.bf16.msra.mxu1 %v4467_v23  ;;  %4192 = vmatprep.subr.bf16.mxu0 %v4685_v2 }
  0xe6   : > { %4212 = vmatprep.subr.bf16.mxu1 %v4685_v2  ;;  %4206 = vmatprep.mubr.msk.bf16.mxu0 %vm4686_vm0, %v4685_v2 }
  0xe7   : > { %4226 = vmatprep.mubr.msk.bf16.mxu1 %vm4686_vm0, %v4685_v2 }
  0xe8   : > { %4193 = vmatpush3.bf16.msra.mxu0 %v4468_v24 }
  0xe9   : > { %4213 = vmatpush3.bf16.msra.mxu1 %v4469_v25  ;;  %4194 = vmatprep.subr.bf16.mxu0 %v4685_v2  ;;  %v3608_v25 = vld [vmem:[%s4856_s19 + $0x3] ss:$0 sm:$0xff] }
  0xea   : > { %4214 = vmatprep.subr.bf16.mxu1 %v4685_v2 }
  0xec   : > { %4195 = vmatpush3.bf16.msra.mxu0 %v4470_v26 }
  0xed   : > { %4215 = vmatpush3.bf16.msra.mxu1 %v4471_v27  ;;  %4196 = vmatprep.subr.bf16.mxu0 %v4685_v2 }
  0xee   : > { %4216 = vmatprep.subr.bf16.mxu1 %v4685_v2 }
  0xf0   : > { %4197 = vmatpush3.bf16.msra.mxu0 %v4472_v28 }
  0xf1   : > { %4217 = vmatpush3.bf16.msra.mxu1 %v4473_v29  ;;  %4198 = vmatprep.subr.bf16.mxu0 %v4685_v2 }
  0xf2   : > { %4218 = vmatprep.subr.bf16.mxu1 %v4685_v2 }
  0xf4   : > { %4199 = vmatpush3.bf16.msra.mxu0 %v4474_v30 }
  0xf5   : > { %4219 = vmatpush3.bf16.msra.mxu1 %v4475_v31  ;;  %4200 = vmatprep.subr.bf16.mxu0 %v4685_v2 }
  0xf6   : > { %4220 = vmatprep.subr.bf16.mxu1 %v4685_v2 }
  0xf8   : > { %4201 = vmatpush3.bf16.msra.mxu0 %v4476_v32 }
  0xf9   : > { %4221 = vmatpush3.bf16.msra.mxu1 %v4477_v33  ;;  %4202 = vmatprep.subr.bf16.mxu0 %v4685_v2 }
  0xfa   : > { %4222 = vmatprep.subr.bf16.mxu1 %v4685_v2 }
  0xfc   : > { %4203 = vmatpush3.bf16.msra.mxu0 %v4478_v34 }
  0xfd   : > { %4223 = vmatpush3.bf16.msra.mxu1 %v4479_v35  ;;  %4204 = vmatprep.subr.bf16.mxu0 %v4685_v2  ;;  %v3613_v35 = vld [vmem:[%s4856_s19 + $0x8] ss:$0 sm:$0xff] }
  0xfe   : > { %4224 = vmatprep.subr.bf16.mxu1 %v4685_v2 }
 0x100   : > { %4205 = vmatpush3.bf16.msra.mxu0 %v4480_v36  ;;  %v3614_v36 = vld [vmem:[%s4856_s19 + $0x9] ss:$0 sm:$0xff] }
 0x101   : > { %4225 = vmatpush3.bf16.msra.mxu1 %v4481_v37  ;;  %4230 = vmatprep.subr.bf16.mxu0 %v4685_v2 }
 0x102   : > { %4236 = vmatprep.subr.bf16.mxu1 %v4685_v2 }
 0x103   : > { %4207 = vmatmul.mubr.bf16.vlgmr.msra.gmra.mxu0 %v4940_v19 }
 0x104   : > { %4227 = vmatmul.mubr.bf16.vlgmr.msra.gmra.mxu1 %v4940_v19  ;;  %4232 = vmatprep.mubr.msk.bf16.mxu0 %vm4686_vm0, %v4685_v2 }
 0x105   : > { %4238 = vmatprep.mubr.msk.bf16.mxu1 %vm4686_vm0, %v4685_v2 }
 0x123   : > { %v1013_v38 = vpop.f32.mrf.mxu0 }
 0x124   : > { %v1101_v39 = vpop.f32.mrf.mxu1  ;;  %v1014_v7 = vadd.f32 %v3605_v62, %v1013_v38 }
 0x125   : > { %v4008_v40 = vpop.f32.mrf.mxu0  ;;  %v1102_v9 = vadd.f32 %v3606_v1, %v1101_v39 }
 0x126   : > { %v4028_v41 = vpop.f32.mrf.mxu1  ;;  %v1987_v10 = vpack.c.bf16 %v1014_v7, %v1014_v7 }
 0x127   : > { %v1016_v42 = vpop.f32.mrf.mxu0  ;;  %v1988_v11 = vpack.c.bf16 %v1102_v9, %v1102_v9 }
 0x128   : > { %v1104_v43 = vpop.f32.mrf.mxu1 }
 0x129   : > { %v4009_v44 = vpop.f32.mrf.mxu0 }
 0x12a   : > { %v4029_v45 = vpop.f32.mrf.mxu1 }
 0x143   : > { %v1189_v46 = vpop.f32.mrf.mxu0 }
 0x144   : > { %v1277_v47 = vpop.f32.mrf.mxu1  ;;  %v1190_v30 = vadd.f32 %v3607_v22, %v1189_v46 }
 0x145   : > { %v4048_v48 = vpop.f32.mrf.mxu0  ;;  %v1278_v32 = vadd.f32 %v3608_v25, %v1277_v47 }
 0x146   : > { %v4068_v19 = vpop.f32.mrf.mxu1  ;;  %v1989_v33 = vpack.c.bf16 %v1190_v30, %v1190_v30 }
 0x147   : > { %v1192_v49 = vpop.f32.mrf.mxu0  ;;  %v1990_v34 = vpack.c.bf16 %v1278_v32, %v1278_v32 }
 0x148   : > { %v1280_v50 = vpop.f32.mrf.mxu1 }
 0x149   : > { %v4049_v51 = vpop.f32.mrf.mxu0  ;;  %v3615_v50 = vld [vmem:[%s4856_s19 + $0xa] ss:$0 sm:$0xff] }
 0x14a   : > { %v4069_v52 = vpop.f32.mrf.mxu1  ;;  %v3616_v51 = vld [vmem:[%s4856_s19 + $0xb] ss:$0 sm:$0xff]  ;;  %s5444_s19 = sld [smem:[#allocation22_spill]] }
 0x150   : > { %s5445_s25 = scalar_lea.vmem %s5444_s19, %s4835_s30 }
 0x163   : > { %v1365_v55 = vpop.f32.mrf.mxu0 }
 0x164   : > { %v1366_v56 = vadd.f32 %v3609_v53, %v1365_v55  ;;  %v1453_v57 = vpop.f32.mrf.mxu1 }
 0x165   : > { %v1454_v58 = vadd.f32 %v3610_v54, %v1453_v57  ;;  %v4088_v59 = vpop.f32.mrf.mxu0 }
 0x166   : > { %v1991_v60 = vpack.c.bf16 %v1366_v56, %v1366_v56  ;;  %v4108_v61 = vpop.f32.mrf.mxu1 }
 0x167   : > { %v1992_v63 = vpack.c.bf16 %v1454_v58, %v1454_v58  ;;  %v1368_v0 = vpop.f32.mrf.mxu0 }
 0x168   : > { %v2000_v3 = vsel %vm1995_vm1, %v1991_v60, 0  ;;  %v1456_v4 = vpop.f32.mrf.mxu1 }
 0x169   : > { %v2046_v5 = vsel %vm1995_vm1, %v1992_v63, 0  ;;  %v4089_v6 = vpop.f32.mrf.mxu0  ;;  %4231 = vmatpush3.bf16.xpose.msra.mxu0 %v2000_v3 }
 0x16a   : > { %v4109_v8 = vpop.f32.mrf.mxu1  ;;  %4237 = vmatpush3.bf16.xpose.msra.mxu1 %v2046_v5  ;;  %4242 = vmatprep.subr.bf16.mxu0 %v4685_v2 }
 0x16b   : > { %4248 = vmatprep.subr.bf16.mxu1 %v4685_v2 }
 0x170   : > { %4233 = vmatmul.mubr.msk.bf16.vlgmr.msra.gmra.mxu0 %vm1995_vm1, %v1987_v10 }
 0x171   : > { %4239 = vmatmul.mubr.msk.bf16.vlgmr.msra.gmra.mxu1 %vm1995_vm1, %v1988_v11  ;;  %4244 = vmatprep.mubr.msk.bf16.mxu0 %vm4686_vm0, %v4685_v2 }
 0x172   : > { %4250 = vmatprep.mubr.msk.bf16.mxu1 %vm4686_vm0, %v4685_v2 }
 0x183   : > { %v1541_v14 = vpop.f32.mrf.mxu0 }
 0x184   : > { %v1542_v15 = vadd.f32 %v3611_v12, %v1541_v14  ;;  %v1629_v16 = vpop.f32.mrf.mxu1 }
 0x185   : > { %v1630_v17 = vadd.f32 %v3612_v13, %v1629_v16  ;;  %v4128_v18 = vpop.f32.mrf.mxu0 }
 0x186   : > { %v1993_v20 = vpack.c.bf16 %v1542_v15, %v1542_v15  ;;  %v4148_v21 = vpop.f32.mrf.mxu1 }
 0x187   : > { %v1994_v23 = vpack.c.bf16 %v1630_v17, %v1630_v17  ;;  %v1544_v24 = vpop.f32.mrf.mxu0 }
 0x188   : > { %v2092_v26 = vsel %vm1995_vm1, %v1993_v20, 0  ;;  %v1632_v27 = vpop.f32.mrf.mxu1 }
 0x189   : > { %v2138_v28 = vsel %vm1995_vm1, %v1994_v23, 0  ;;  %v4129_v29 = vpop.f32.mrf.mxu0  ;;  %4243 = vmatpush3.bf16.xpose.msra.mxu0 %v2092_v26 }
 0x18a   : > { %v4149_v31 = vpop.f32.mrf.mxu1  ;;  %4249 = vmatpush3.bf16.xpose.msra.mxu1 %v2138_v28  ;;  %4254 = vmatprep.subr.bf16.mxu0 %v4685_v2 }
 0x18b   : > { %4260 = vmatprep.subr.bf16.mxu1 %v4685_v2 }
 0x190   : > { %4245 = vmatmul.mubr.msk.bf16.vlgmr.msra.gmra.mxu0 %vm1995_vm1, %v1989_v33 }
 0x191   : > { %4251 = vmatmul.mubr.msk.bf16.vlgmr.msra.gmra.mxu1 %vm1995_vm1, %v1990_v34  ;;  %4256 = vmatprep.mubr.msk.bf16.mxu0 %vm4686_vm0, %v4685_v2 }
 0x192   : > { %4262 = vmatprep.mubr.msk.bf16.mxu1 %vm4686_vm0, %v4685_v2 }
 0x1a3   : > { %v1717_v37 = vpop.f32.mrf.mxu0 }
 0x1a4   : > { %v1718_v38 = vadd.f32 %v3613_v35, %v1717_v37  ;;  %v1805_v39 = vpop.f32.mrf.mxu1 }
 0x1a5   : > { %v4168_v40 = vpop.f32.mrf.mxu0  ;;  %v1806_v41 = vadd.f32 %v3614_v36, %v1805_v39 }
 0x1a6   : > { %v2233_v42 = vpack.c.bf16 %v1718_v38, %v1718_v38  ;;  %v4188_v43 = vpop.f32.mrf.mxu1 }
 0x1a7   : > { %v1720_v44 = vpop.f32.mrf.mxu0  ;;  %v2234_v45 = vpack.c.bf16 %v1806_v41, %v1806_v41 }
 0x1a8   : > { %v2242_v46 = vsel %vm2240_vm2, %v2233_v42, 0  ;;  %v1808_v47 = vpop.f32.mrf.mxu1 }
 0x1a9   : > { %v2288_v48 = vsel %vm2240_vm2, %v2234_v45, 0  ;;  %v4169_v19 = vpop.f32.mrf.mxu0  ;;  %4255 = vmatpush3.bf16.msra.mxu0 %v2242_v46 }
 0x1aa   : > { %v4189_v49 = vpop.f32.mrf.mxu1  ;;  %4261 = vmatpush3.bf16.msra.mxu1 %v2288_v48  ;;  %4266 = vmatprep.subr.bf16.mxu0 %v4685_v2 }
 0x1ab   : > { %4272 = vmatprep.subr.bf16.mxu1 %v4685_v2 }
 0x1c3   : > { %v1893_v52 = vpop.f32.mrf.mxu0 }
 0x1c4   : > { %v1894_v53 = vadd.f32 %v3615_v50, %v1893_v52  ;;  %v1981_v54 = vpop.f32.mrf.mxu1 }
 0x1c5   : > { %v1982_v55 = vadd.f32 %v3616_v51, %v1981_v54  ;;  %v4208_v56 = vpop.f32.mrf.mxu0 }
 0x1c6   : > { %v2235_v57 = vpack.c.bf16 %v1894_v53, %v1894_v53  ;;  %v4228_v58 = vpop.f32.mrf.mxu1 }
 0x1c7   : > { %v2236_v59 = vpack.c.bf16 %v1982_v55, %v1982_v55  ;;  %v1896_v60 = vpop.f32.mrf.mxu0 }
 0x1c8   : > { %v5177_v61 = vsel %vm2240_vm2, %v2235_v57, 0  ;;  %v1984_v62 = vpop.f32.mrf.mxu1 }
 0x1c9   : > { %v5180_v63 = vsel %vm2240_vm2, %v2236_v59, 0  ;;  %v4209_v0 = vpop.f32.mrf.mxu0  ;;  %v4482_v59 = vld [vmem:[%s4851_s26 + $0x8] sm:$0xff]  }
 0x1ca   : > { %v4229_v1 = vpop.f32.mrf.mxu1  ;;  %v4483_v0 = vld [vmem:[%s4851_s26] sm:$0xff]  }
 0x1cb   : > { %v4484_v1 = vld [vmem:[%s4851_s26 + $0x18] sm:$0xff]  }
 0x230   : > { %v2036_v3 = vpop.f32.mrf.mxu0 }
 0x231   : > { %v2180_v4 = vmul.f32 0.17677669, %v2036_v3  ;;  %v2082_v5 = vpop.f32.mrf.mxu1  ;;  %v4485_v3 = vld [vmem:[%s4851_s26 + $0x10] sm:$0xff]  }
 0x232   : > { %v4234_v6 = vpop.f32.mrf.mxu0  ;;  %v2181_v7 = vmul.f32 0.17677669, %v2082_v5  ;;  %v4486_v5 = vld [vmem:[%s4851_s26 + $0x28] sm:$0xff]  }
 0x233   : > { %v4240_v8 = vpop.f32.mrf.mxu1  ;;  %v2185_v9 = vsel %vm2184_vm3, %v2180_v4, -inf }
 0x234   : > { %2186 = vmax.xlane.f32.xlu0 %v2185_v9  ;;  %v2039_v10 = vpop.f32.mrf.mxu0  ;;  %v2188_v14 = vsel %vm2184_vm3, %v2181_v7, -inf }
 0x235   : > { %v2085_v11 = vpop.f32.mrf.mxu1  ;;  %v4487_v10 = vld [vmem:[%s4851_s26 + $0x20] sm:$0xff]  }
 0x236   : > { %v4235_v12 = vpop.f32.mrf.mxu0  ;;  %v4488_v11 = vld [vmem:[%s4851_s26 + $0x38] sm:$0xff]  }
 0x237   : > { %v4241_v13 = vpop.f32.mrf.mxu1 }
 0x238   : > { %2189 = vmax.xlane.f32.xlu0 %v2188_v14 }
 0x250   : > { %v2128_v15 = vpop.f32.mrf.mxu0 }
 0x251   : > { %v2182_v16 = vmul.f32 0.17677669, %v2128_v15  ;;  %v2174_v17 = vpop.f32.mrf.mxu1 }
 0x252   : > { %v4246_v18 = vpop.f32.mrf.mxu0  ;;  %v2183_v20 = vmul.f32 0.17677669, %v2174_v17 }
 0x253   : > { %v4252_v21 = vpop.f32.mrf.mxu1  ;;  %v2191_v22 = vsel %vm2184_vm3, %v2182_v16, -inf }
 0x254   : > { %2192 = vmax.xlane.f32.xlu1 %v2191_v22  ;;  %v2131_v23 = vpop.f32.mrf.mxu0  ;;  %v2194_v27 = vsel %vm2184_vm3, %v2183_v20, -inf }
 0x255   : > { %v2177_v24 = vpop.f32.mrf.mxu1 }
 0x256   : > { %v4247_v25 = vpop.f32.mrf.mxu0 }
 0x257   : > { %v4253_v26 = vpop.f32.mrf.mxu1 }
 0x258   : > { %2195 = vmax.xlane.f32.xlu1 %v2194_v27 }
 0x2bd   : > { %v2187_v28 = vpop.xlane.xlu0 %2186 }
 0x2be   : > { %v2197_v29 = vsub.f32 %v2180_v4, %v2187_v28 }
 0x2c0   : > { %v2201_v30 = vmul.f32 1.442695, %v2197_v29 }
 0x2c1   : > { %v2190_v31 = vpop.xlane.xlu0 %2189 }
 0x2c2   : > { %4570 = vpow2.f32 %v2201_v30  ;;  %v2198_v32 = vsub.f32 %v2181_v7, %v2190_v31 }
 0x2c4   : > { %v2203_v33 = vmul.f32 1.442695, %v2198_v32 }
 0x2c6   : > { %4572 = vpow2.f32 %v2203_v33 }
 0x2cf   : > { %v4571_v34 = vpop.eup %4570 }
 0x2d0   : > { %v2209_v35 = vsel %vm2184_vm3, %v4571_v34, 0.0 }
 0x2d1   : > { %2210 = vadd.xlane.f32.xlu0 %v2209_v35 }
 0x2d3   : > { %v4573_v36 = vpop.eup %4572 }
 0x2d4   : > { %v2212_v37 = vsel %vm2184_vm3, %v4573_v36, 0.0 }
 0x2d5   : > { %2213 = vadd.xlane.f32.xlu1 %v2212_v37 }
 0x2dd   : > { %v2193_v38 = vpop.xlane.xlu1 %2192 }
 0x2de   : > { %v2199_v39 = vsub.f32 %v2182_v16, %v2193_v38  ;;  %v4489_v16 = vld [vmem:[%s4851_s26 + $0x30] sm:$0xff]   ;;  %s3391_s26 = scalar_lea.hbm %s5450_s7, %s3804_s27 }
 0x2e0   : > { %v2205_v40 = vmul.f32 1.442695, %v2199_v39 }
 0x2e1   : > { %v2196_v41 = vpop.xlane.xlu1 %2195 }
 0x2e2   : > { %4574 = vpow2.f32 %v2205_v40  ;;  %v2200_v42 = vsub.f32 %v2183_v20, %v2196_v41 }
 0x2e4   : > { %v2207_v43 = vmul.f32 1.442695, %v2200_v42  ;;  %v3733_v42 = vld [vmem:[%s5442_s2] ss:$0 sm:$0xff] }
 0x2e6   : > { %4576 = vpow2.f32 %v2207_v43 }
 0x2ef   : > { %v4575_v44 = vpop.eup %4574 }
 0x2f0   : > { %v2215_v45 = vsel %vm2184_vm3, %v4575_v44, 0.0 }
 0x2f1   : > { %2216 = vadd.xlane.f32.xlu0 %v2215_v45 }
 0x2f3   : > { %v4577_v46 = vpop.eup %4576 }
 0x2f4   : > { %v2218_v47 = vsel %vm2184_vm3, %v4577_v46, 0.0 }
 0x2f5   : > { %2219 = vadd.xlane.f32.xlu1 %v2218_v47 }
 0x35a   : > { %v2211_v48 = vpop.xlane.xlu0 %2210 }
 0x35b   : > { %4578 = vrcp.f32 %v2211_v48  ;;  %v4590_v48 = vld [vmem:[%s4899_s24] sm:$0xff] }
 0x35e   : > { %v2214_v19 = vpop.xlane.xlu1 %2213 }
 0x35f   : > { %4580 = vrcp.f32 %v2214_v19 }
 0x368   : > { %v4579_v49 = vpop.eup %4578 }
 0x369   : > { %v2225_v50 = vmul.f32 %v4579_v49, %v4571_v34 }
 0x36b   : > { %v2229_v51 = vpack.c.bf16 %v2225_v50, %v2225_v50  ;;  %v4490_v50 = vld [vmem:[%s4875_s29 + $0xe0] ss:$16 sps:$4 sm:$0xff]  }
 0x36c   : > { %v4581_v52 = vpop.eup %4580 }
 0x36d   : > { %4257 = vmatmul.mubr.msk.bf16.vlgmr.msra.gmra.mxu0 %vm2184_vm3, %v2229_v51  ;;  %v2226_v53 = vmul.f32 %v4581_v52, %v4573_v36  ;;  %v4492_v51 = vld [vmem:[%s4875_s29 + $0xe4] ss:$16 sps:$4 sm:$0xff]   ;;  %v4493_v52 = vld [vmem:[%s4875_s29 + $0xe8] ss:$16 sps:$4 sm:$0xff]  }
 0x36e   : > { %4267 = vmatpush3.bf16.msra.mxu0 %v5177_v61  ;;  %4268 = vmatprep.mubr.msk.bf16.mxu0 %vm4686_vm0, %v4685_v2 }
 0x36f   : > { %v2230_v54 = vpack.c.bf16 %v2226_v53, %v2226_v53  ;;  %4278 = vmatprep.subr.bf16.mxu0 %v4685_v2  ;;  %v4495_v53 = vld [vmem:[%s4875_s29 + $0xec] ss:$16 sps:$4 sm:$0xff]  }
 0x371   : > { %4263 = vmatmul.mubr.msk.bf16.vlgmr.msra.gmra.mxu1 %vm2184_vm3, %v2230_v54  ;;  %v4498_v54 = vld [vmem:[%s4875_s29 + $0xc4] ss:$16 sps:$4 sm:$0xff]  }
 0x372   : > { %4273 = vmatpush3.bf16.msra.mxu1 %v5180_v63  ;;  %4274 = vmatprep.mubr.msk.bf16.mxu1 %vm4686_vm0, %v4685_v2 }
 0x373   : > { %4286 = vmatprep.subr.bf16.mxu1 %v4685_v2 }
 0x37a   : > { %v2217_v55 = vpop.xlane.xlu0 %2216 }
 0x37b   : > { %4582 = vrcp.f32 %v2217_v55  ;;  %v4501_v55 = vld [vmem:[%s4875_s29 + $0xcc] ss:$16 sps:$4 sm:$0xff]  }
 0x37e   : > { %v2220_v56 = vpop.xlane.xlu1 %2219 }
 0x37f   : > { %4584 = vrcp.f32 %v2220_v56  ;;  %v4496_v56 = vld [vmem:[%s4875_s29 + $0xc0] ss:$16 sps:$4 sm:$0xff]  }
 0x388   : > { %v4583_v57 = vpop.eup %4582 }
 0x389   : > { %v2227_v58 = vmul.f32 %v4583_v57, %v4575_v44  ;;  %v4499_v57 = vld [vmem:[%s4875_s29 + $0xc8] ss:$16 sps:$4 sm:$0xff]  }
 0x38b   : > { %v2231_v60 = vpack.c.bf16 %v2227_v58, %v2227_v58 }
 0x38c   : > { %v4585_v61 = vpop.eup %4584 }
 0x38d   : > { %4269 = vmatmul.mubr.msk.bf16.vlgmr.msra.gmra.mxu0 %vm2184_vm3, %v2231_v60  ;;  %v2228_v62 = vmul.f32 %v4585_v61, %v4577_v46 }
 0x38e   : > { %4279 = vmatpush3.bf16.msra.mxu0 %v4482_v59  ;;  %4282 = vmatprep.mubr.msk.bf16.mxu0 %vm4686_vm0, %v4685_v2 }
 0x38f   : > { %v2232_v63 = vpack.c.bf16 %v2228_v62, %v2228_v62  ;;  %4280 = vmatprep.subr.bf16.mxu0 %v4685_v2  ;;  %v4504_v62 = vld [vmem:[%s4875_s29 + $0xa4] ss:$16 sps:$4 sm:$0xff]  }
 0x391   : > { %4275 = vmatmul.mubr.msk.bf16.vlgmr.msra.gmra.mxu1 %vm2184_vm3, %v2232_v63  ;;  %v4507_v63 = vld [vmem:[%s4875_s29 + $0xac] ss:$16 sps:$4 sm:$0xff]  }
 0x392   : > { %4290 = vmatprep.mubr.msk.bf16.mxu1 %vm4686_vm0, %v4685_v2  ;;  %4281 = vmatpush3.bf16.msra.mxu0 %v4483_v0  ;;  %v4502_v0 = vld [vmem:[%s4875_s29 + $0xa0] ss:$16 sps:$4 sm:$0xff]  }
 0x393   : > { %4287 = vmatpush3.bf16.msra.mxu1 %v4484_v1  ;;  %4294 = vmatprep.subr.bf16.mxu0 %v4685_v2  ;;  %v4505_v1 = vld [vmem:[%s4875_s29 + $0xa8] ss:$16 sps:$4 sm:$0xff]  }
 0x394   : > { %4288 = vmatprep.subr.bf16.mxu1 %v4685_v2 }
 0x397   : > { %4289 = vmatpush3.bf16.msra.mxu1 %v4485_v3  ;;  %v4508_v3 = vld [vmem:[%s4875_s29 + $0x80] ss:$16 sps:$4 sm:$0xff]  }
 0x398   : > { %4302 = vmatprep.subr.bf16.mxu1 %v4685_v2 }
 0x42d   : > { %v2278_v4 = vpop.f32.mrf.mxu0 }
 0x42e   : > { %v2422_v6 = vpack.c.bf16 %v2278_v4, %v2278_v4  ;;  %v4510_v4 = vld [vmem:[%s4875_s29 + $0x84] ss:$16 sps:$4 sm:$0xff]  }
 0x42f   : > { %v4258_v7 = vpop.f32.mrf.mxu0 }
 0x430   : > { %4283 = vmatmul.mubr.msk.bf16.vlgmr.msra.gmra.mxu0 %vm1995_vm1, %v2422_v6  ;;  %v4513_v6 = vld [vmem:[%s4875_s29 + $0x8c] ss:$16 sps:$4 sm:$0xff]   ;;  %v4516_v7 = vld [vmem:[%s4875_s29 + $0x64] ss:$16 sps:$4 sm:$0xff]  }
 0x431   : > { %v2281_v8 = vpop.f32.mrf.mxu0  ;;  %v2324_v9 = vpop.f32.mrf.mxu1  ;;  %4295 = vmatpush3.bf16.msra.mxu0 %v4486_v5  ;;  %4298 = vmatprep.mubr.msk.bf16.mxu0 %vm4686_vm0, %v4685_v2  ;;  %v4511_v5 = vld [vmem:[%s4875_s29 + $0x88] ss:$16 sps:$4 sm:$0xff]  }
 0x432   : > { %v2423_v12 = vpack.c.bf16 %v2324_v9, %v2324_v9  ;;  %4296 = vmatprep.subr.bf16.mxu0 %v4685_v2  ;;  %v4519_v8 = vld [vmem:[%s4875_s29 + $0x6c] ss:$16 sps:$4 sm:$0xff]   ;;  %v4514_v9 = vld [vmem:[%s4875_s29 + $0x60] ss:$16 sps:$4 sm:$0xff]  }
 0x433   : > { %v4259_v13 = vpop.f32.mrf.mxu0  ;;  %v4264_v14 = vpop.f32.mrf.mxu1 }
 0x434   : > { %4291 = vmatmul.mubr.msk.bf16.vlgmr.msra.gmra.mxu1 %vm1995_vm1, %v2423_v12  ;;  %v4525_v12 = vld [vmem:[%s4875_s29 + $0x4c] ss:$16 sps:$4 sm:$0xff]   ;;  %v4687_v13 = vmov 0   ;;  %v4520_v14 = vld [vmem:[%s4875_s29 + $0x40] ss:$16 sps:$4 sm:$0xff]  }
 0x435   : > { %v2327_v15 = vpop.f32.mrf.mxu1  ;;  %4297 = vmatpush3.bf16.msra.mxu0 %v4487_v10  ;;  %4303 = vmatpush3.bf16.msra.mxu1 %v4488_v11  ;;  %v4517_v10 = vld [vmem:[%s4875_s29 + $0x68] ss:$16 sps:$4 sm:$0xff]   ;;  %v4522_v11 = vld [vmem:[%s4875_s29 + $0x44] ss:$16 sps:$4 sm:$0xff]  }
 0x436   : > { %4304 = vmatprep.subr.bf16.mxu1 %v4685_v2  ;;  %4306 = vmatprep.mubr.msk.bf16.mxu1 %vm4686_vm0, %v4685_v2  ;;  %v4523_v15 = vld [vmem:[%s4875_s29 + $0x48] ss:$16 sps:$4 sm:$0xff]  }
 0x437   : > { %v4265_v17 = vpop.f32.mrf.mxu1  ;;  %2917 = vmatprep.subr.bf16.mxu0 %v4492_v51  ;;  %v4556_v51 = vld [vmem:[%s4885_s12 + $0x18] sm:$0xff]  }
 0x438   : > { %v4531_v17 = vld [vmem:[%s4875_s29 + $0x2c] ss:$16 sps:$4 sm:$0xff]  }
 0x439   : > { %4305 = vmatpush3.bf16.msra.mxu1 %v4489_v16  ;;  %v4528_v16 = vld [vmem:[%s4875_s29 + $0x24] ss:$16 sps:$4 sm:$0xff]  }
 0x43a   : > { %2958 = vmatprep.subr.bf16.mxu1 %v4495_v53  ;;  %v4558_v53 = vld [vmem:[%s4885_s12 + $0x50] sm:$0xff]  }
 0x44d   : > { %v2370_v18 = vpop.f32.mrf.mxu0 }
 0x44e   : > { %v2424_v20 = vpack.c.bf16 %v2370_v18, %v2370_v18  ;;  %v4526_v18 = vld [vmem:[%s4875_s29 + $0x20] ss:$16 sps:$4 sm:$0xff]  }
 0x44f   : > { %v4270_v21 = vpop.f32.mrf.mxu0 }
 0x450   : > { %4299 = vmatmul.mubr.msk.bf16.vlgmr.msra.gmra.mxu0 %vm1995_vm1, %v2424_v20  ;;  %v4529_v20 = vld [vmem:[%s4875_s29 + $0x28] ss:$16 sps:$4 sm:$0xff]   ;;  %v4534_v21 = vld [vmem:[%s4875_s29 + $0x4] ss:$16 sps:$4 sm:$0xff]  }
 0x451   : > { %v2373_v22 = vpop.f32.mrf.mxu0  ;;  %v2416_v23 = vpop.f32.mrf.mxu1  ;;  %2918 = vmatpush1.bf16.msra.mxu0 %v4490_v50  ;;  %2949 = vmatprep.mubr.bf16.mxu0 %v4687_v13  ;;  %v4555_v50 = vld [vmem:[%s4885_s12 + $0xd8] sm:$0xff]  }
 0x452   : > { %v2425_v24 = vpack.c.bf16 %v2416_v23, %v2416_v23  ;;  %2919 = vmatprep.subr.bf16.mxu0 %v4498_v54  ;;  %v4537_v22 = vld [vmem:[%s4875_s29 + $0xc] ss:$16 sps:$4 sm:$0xff]   ;;  %v4532_v23 = vld [vmem:[%s4875_s29] ss:$16 sps:$4 sm:$0xff]  }
 0x453   : > { %v4271_v25 = vpop.f32.mrf.mxu0  ;;  %v4276_v26 = vpop.f32.mrf.mxu1  ;;  %v4559_v54 = vld [vmem:[%s4885_s12 + $0xd0] sm:$0xff]  }
 0x454   : > { %4307 = vmatmul.mubr.msk.bf16.vlgmr.msra.gmra.mxu1 %vm1995_vm1, %v2425_v24  ;;  %v4535_v24 = vld [vmem:[%s4875_s29 + $0x8] ss:$16 sps:$4 sm:$0xff]  }
 0x455   : > { %v2419_v27 = vpop.f32.mrf.mxu1  ;;  %2959 = vmatpush1.bf16.msra.mxu1 %v4493_v52  ;;  %2920 = vmatpush1.bf16.msra.mxu0 %v4496_v56  ;;  %v4538_v25 = vld [vmem:[%s4885_s12 + $0x78] sm:$0xff]   ;;  %v4561_v56 = vld [vmem:[%s4885_s12 + $0x90] sm:$0xff]  }
 0x456   : > { %2960 = vmatprep.subr.bf16.mxu1 %v4501_v55  ;;  %2921 = vmatprep.subr.bf16.mxu0 %v4504_v62  ;;  %v4539_v26 = vld [vmem:[%s4885_s12 + $0xf8] sm:$0xff]   ;;  %v4560_v55 = vld [vmem:[%s4885_s12 + $0x10] sm:$0xff]   ;;  %v4567_v62 = vld [vmem:[%s4885_s12 + $0xc0] sm:$0xff]  }
 0x457   : > { %v4277_v28 = vpop.f32.mrf.mxu1  ;;  %2990 = vmatprep.mubr.bf16.mxu1 %v4687_v13  ;;  %v4557_v52 = vld [vmem:[%s4885_s12 + $0x98] sm:$0xff]  }
 0x459   : > { %2961 = vmatpush1.bf16.msra.mxu1 %v4499_v57  ;;  %2922 = vmatpush1.bf16.msra.mxu0 %v4502_v0  ;;  %v4562_v57 = vld [vmem:[%s4885_s12 + $0x48] sm:$0xff]   ;;  %v4569_v0 = vld [vmem:[%s4885_s12 + $0x80] sm:$0xff]  }
 0x45a   : > { %2962 = vmatprep.subr.bf16.mxu1 %v4507_v63  ;;  %2923 = vmatprep.subr.bf16.mxu0 %v4510_v4  ;;  %v4568_v63 = vld [vmem:[%s4885_s12] sm:$0xff]  }
 0x45d   : > { %2963 = vmatpush1.bf16.msra.mxu1 %v4505_v1  ;;  %2924 = vmatpush1.bf16.msra.mxu0 %v4508_v3  ;;  %v2737_v1 = vlaneseq }
 0x45e   : > { %2964 = vmatprep.subr.bf16.mxu1 %v4513_v6  ;;  %2925 = vmatprep.subr.bf16.mxu0 %v4516_v7  ;;  %v2735_v6 = vld [vmem:[%s4880_s22] sm:$0xf]  ;;  %s5447_s22 = sld [smem:[#allocation6_spill]] }
 0x45f   : > { %v2738_v3 = vshrl.u32 %v2737_v1, 7 }
 0x461   : > { %2965 = vmatpush1.bf16.msra.mxu1 %v4511_v5  ;;  %2926 = vmatpush1.bf16.msra.mxu0 %v4514_v9  ;;  %v2739_v4 = vsub.s32 0, %v2738_v3  ;;  %v2747_v5 = vsub.s32 2, %v2738_v3  ;;  %v2743_v7 = vsub.s32 1, %v2738_v3 }
 0x462   : > { %2966 = vmatprep.subr.bf16.mxu1 %v4519_v8  ;;  %2927 = vmatprep.subr.bf16.mxu0 %v4522_v11  ;;  %v2751_v8 = vsub.s32 3, %v2738_v3 }
 0x463   : > { %v2740_v9 = vrot.slane %v2735_v6, %v2739_v4  ;;  %v2744_v11 = vrot.slane %v2735_v6, %v2743_v7 }
 0x465   : > { %2967 = vmatpush1.bf16.msra.mxu1 %v4517_v10  ;;  %2928 = vmatpush1.bf16.msra.mxu0 %v4520_v14  ;;  %v2748_v10 = vrot.slane %v2735_v6, %v2747_v5 }
 0x466   : > { %2968 = vmatprep.subr.bf16.mxu1 %v4525_v12  ;;  %2929 = vmatprep.subr.bf16.mxu0 %v4528_v16  ;;  %v2752_v12 = vrot.slane %v2735_v6, %v2751_v8 }
 0x469   : > { %2969 = vmatpush1.bf16.msra.mxu1 %v4523_v15  ;;  %2930 = vmatpush1.bf16.msra.mxu0 %v4526_v18 }
 0x46a   : > { %2970 = vmatprep.subr.bf16.mxu1 %v4531_v17  ;;  %2931 = vmatprep.subr.bf16.mxu0 %v4534_v21 }
 0x46d   : > { %2971 = vmatpush1.bf16.msra.mxu1 %v4529_v20  ;;  %2932 = vmatpush1.bf16.msra.mxu0 %v4532_v23 }
 0x46e   : > { %2972 = vmatprep.subr.bf16.mxu1 %v4537_v22  ;;  %3946 = vmatprep.subr.bf16.mxu0 %v4538_v25 }
 0x471   : > { %2973 = vmatpush1.bf16.msra.mxu1 %v4535_v24 }
 0x472   : > { %3968 = vmatprep.subr.bf16.mxu1 %v4539_v26 }
 0x4f0   : > { %v2491_v29 = vpop.f32.mrf.mxu0 }
 0x4f2   : > { %v4284_v30 = vpop.f32.mrf.mxu0 }
 0x4f4   : > { %v2494_v2 = vpop.f32.mrf.mxu0  ;;  %v2546_v31 = vpop.f32.mrf.mxu1 }
 0x4f5   : > { %v2662_v37 = vadd.f32 %v2546_v31, %v2491_v29  ;;  %v3734_v2 = vld [vmem:[%s5443_s14] ss:$0 sm:$0xff]  ;;  %s5451_s14 = sand.u32 1, %s5447_s22  }
 0x4f6   : > { %v4285_v32 = vpop.f32.mrf.mxu0  ;;  %v4292_v33 = vpop.f32.mrf.mxu1  ;;  %s3380_s15 = scalar_lea.sflag [#allocation3], %s5451_s14 }
 0x4f7   : > { %v3735_v32 = vld [vmem:[%s5445_s25] ss:$0 sm:$0xff] }
 0x4f8   : > { %v2549_v34 = vpop.f32.mrf.mxu1 }
 0x4fa   : > { %v4293_v35 = vpop.f32.mrf.mxu1 }
 0x4fb   : > { %v4540_v35 = vld [vmem:[%s4885_s12 + $0x38] sm:$0xff]  }
 0x510   : > { %v2601_v36 = vpop.f32.mrf.mxu0 }
 0x511   : > { %v2663_v39 = vadd.f32 %v2662_v37, %v2601_v36  ;;  %v4541_v36 = vld [vmem:[%s4885_s12 + $0xb8] sm:$0xff]  }
 0x512   : > { %v4300_v38 = vpop.f32.mrf.mxu0 }
 0x513   : > { %v4542_v38 = vld [vmem:[%s4885_s12 + $0x70] sm:$0xff]  }
 0x514   : > { %v2604_v40 = vpop.f32.mrf.mxu0  ;;  %v2656_v41 = vpop.f32.mrf.mxu1 }
 0x515   : > { %v2664_v43 = vadd.f32 %v2663_v39, %v2656_v41  ;;  %v4543_v39 = vld [vmem:[%s4885_s12 + $0xf0] sm:$0xff]  }
 0x516   : > { %v4301_v44 = vpop.f32.mrf.mxu0  ;;  %v4308_v45 = vpop.f32.mrf.mxu1  ;;  %v4544_v40 = vld [vmem:[%s4885_s12 + $0x30] sm:$0xff]  }
 0x517   : > { %v2672_v46 = vadd.f32 %v3733_v42, %v2664_v43  ;;  %v4545_v41 = vld [vmem:[%s4885_s12 + $0xb0] sm:$0xff]   ;;  %v4546_v42 = vld [vmem:[%s4885_s12 + $0x68] sm:$0xff]  }
 0x518   : > { %v2659_v47 = vpop.f32.mrf.mxu1  ;;  %v4547_v43 = vld [vmem:[%s4885_s12 + $0xe8] sm:$0xff]  }
 0x519   : > { %v2673_v19 = vadd.f32 %v4590_v48, %v2672_v46  ;;  %v4548_v44 = vld [vmem:[%s4885_s12 + $0x28] sm:$0xff]   ;;  %v4550_v46 = vld [vmem:[%s4885_s12 + $0x60] sm:$0xff]  }
 0x51a   : > { %v4309_v49 = vpop.f32.mrf.mxu1  ;;  %v4549_v45 = vld [vmem:[%s4885_s12 + $0xa8] sm:$0xff]   ;;  %v4551_v47 = vld [vmem:[%s4885_s12 + $0xe0] sm:$0xff]  }
 0x51b   : > { %2674 = vadd.xlane.f32.xlu0 %v2673_v19  ;;  %v4552_v48 = vld [vmem:[%s4885_s12 + $0x20] sm:$0xff]   ;;  %v4554_v49 = vld [vmem:[%s4885_s12 + $0x58] sm:$0xff]  }
 0x5a4   : > { %v2675_v58 = vpop.xlane.xlu0 %2674 }
 0x5a5   : > { %v2677_v59 = vmul.f32 0.0078125, %v2675_v58  ;;  %v4563_v58 = vld [vmem:[%s4885_s12 + $0xc8] sm:$0xff]  }
 0x5a7   : > { %v5242_v60 = vsub.f32 %v2673_v19, %v2677_v59  ;;  %v4553_v19 = vld [vmem:[%s4885_s12 + $0xa0] sm:$0xff]   ;;  %v4564_v59 = vld [vmem:[%s4885_s12 + $0x8] sm:$0xff]  }
 0x5a9   : > { %v2679_v61 = vmul.f32 %v5242_v60, %v5242_v60 }
 0x5ab   : > { %2680 = vadd.xlane.f32.xlu1 %v2679_v61  ;;  %v4566_v61 = vld [vmem:[%s4885_s12 + $0x40] sm:$0xff]  }
 0x634   : > { %v2681_v27 = vpop.xlane.xlu1 %2680 }
 0x635   : > { %v2682_v28 = vmul.f32 0.0078125, %v2681_v27 }
 0x637   : > { %v2683_v29 = vadd.f32 1e-05, %v2682_v28 }
 0x639   : > { %4586 = vrsqrt.f32 %v2683_v29 }
 0x646   : > { %v4587_v30 = vpop.eup %4586 }
 0x647   : > { %v2685_v31 = vmul.f32 %v4587_v30, %v5242_v60  ;;  %v4565_v60 = vld [vmem:[%s4885_s12 + $0x88] sm:$0xff]  }
 0x649   : > { %v2693_v33 = vmul.f32 %v3734_v2, %v2685_v31 }
 0x64b   : > { %v5283_v34 = vadd.f32 %v3735_v32, %v2693_v33 }
 0x64d   : > { %v2702_v37 = vpack.c.bf16 %v5283_v34, %v5283_v34 }
 0x64f   : > { %2950 = vmatmul.mubr.bf16.vlgmr.msra.gmra.mxu0 %v2702_v37  ;;  %2991 = vmatmul.mubr.bf16.vlgmr.msra.gmra.mxu1 %v2702_v37 }
 0x650   : > { %3947 = vmatpush3.bf16.msra.mxu0 %v4540_v35  ;;  %3969 = vmatpush3.bf16.msra.mxu1 %v4541_v36  ;;  %v3768_v36 = vld [vmem:[%s639_s16] ss:$0 sm:$0xff] }
 0x651   : > { %3948 = vmatprep.subr.bf16.mxu0 %v4542_v38  ;;  %3970 = vmatprep.subr.bf16.mxu1 %v4543_v39 }
 0x654   : > { %3949 = vmatpush3.bf16.msra.mxu0 %v4544_v40  ;;  %3971 = vmatpush3.bf16.msra.mxu1 %v4545_v41 }
 0x655   : > { %3950 = vmatprep.subr.bf16.mxu0 %v4546_v42  ;;  %3972 = vmatprep.subr.bf16.mxu1 %v4547_v43 }
 0x658   : > { %3951 = vmatpush3.bf16.msra.mxu0 %v4548_v44  ;;  %3973 = vmatpush3.bf16.msra.mxu1 %v4549_v45 }
 0x659   : > { %3952 = vmatprep.subr.bf16.mxu0 %v4550_v46  ;;  %3974 = vmatprep.subr.bf16.mxu1 %v4551_v47 }
 0x65c   : > { %3953 = vmatpush3.bf16.msra.mxu0 %v4552_v48  ;;  %3975 = vmatpush3.bf16.msra.mxu1 %v4553_v19 }
 0x65d   : > { %3954 = vmatprep.subr.bf16.mxu0 %v4554_v49  ;;  %3976 = vmatprep.subr.bf16.mxu1 %v4555_v50 }
 0x660   : > { %3955 = vmatpush3.bf16.msra.mxu0 %v4556_v51  ;;  %3977 = vmatpush3.bf16.msra.mxu1 %v4557_v52 }
 0x661   : > { %3956 = vmatprep.subr.bf16.mxu0 %v4558_v53  ;;  %3978 = vmatprep.subr.bf16.mxu1 %v4559_v54 }
 0x664   : > { %3957 = vmatpush3.bf16.msra.mxu0 %v4560_v55  ;;  %3979 = vmatpush3.bf16.msra.mxu1 %v4561_v56  ;;  %v3802_v56 = vld [vmem:[%s645_s6] ss:$0 sm:$0xff] }
 0x665   : > { %3958 = vmatprep.subr.bf16.mxu0 %v4562_v57  ;;  %3980 = vmatprep.subr.bf16.mxu1 %v4563_v58 }
 0x668   : > { %3959 = vmatpush3.bf16.msra.mxu0 %v4564_v59  ;;  %3981 = vmatpush3.bf16.msra.mxu1 %v4565_v60 }
 0x669   : > { %3960 = vmatprep.subr.bf16.mxu0 %v4566_v61  ;;  %3982 = vmatprep.subr.bf16.mxu1 %v4567_v62 }
 0x66c   : > { %3961 = vmatpush3.bf16.msra.mxu0 %v4568_v63  ;;  %3983 = vmatpush3.bf16.msra.mxu1 %v4569_v0 }
 0x70f   : > { %v2951_v13 = vpop.f32.mrf.mxu0  ;;  %v2992_v14 = vpop.f32.mrf.mxu1 }
 0x710   : > { %v2952_v15 = vadd.f32 %v2951_v13, %v2740_v9  ;;  %v2993_v16 = vadd.f32 %v2992_v14, %v2748_v10 }
 0x711   : > { %v2953_v17 = vpop.f32.mrf.mxu0  ;;  %v2994_v18 = vpop.f32.mrf.mxu1 }
 0x712   : > { %v2954_v20 = vadd.f32 %v2953_v17, %v2744_v11  ;;  %v2995_v21 = vadd.f32 %v2994_v18, %v2752_v12  ;;  %v2999_v22 = vmax.f32 %v2952_v15, 0.0  ;;  %v3001_v23 = vmax.f32 %v2993_v16, 0.0 }
 0x713   : > { %v2955_v24 = vpop.f32.mrf.mxu0  ;;  %v2996_v25 = vpop.f32.mrf.mxu1 }
 0x714   : > { %v3000_v26 = vmax.f32 %v2954_v20, 0.0  ;;  %v3002_v27 = vmax.f32 %v2995_v21, 0.0  ;;  %v3003_v31 = vpack.c.bf16 %v2999_v22, %v2999_v22  ;;  %v3005_v32 = vpack.c.bf16 %v3001_v23, %v3001_v23 }
 0x715   : > { %v2956_v28 = vpop.f32.mrf.mxu0  ;;  %v2997_v29 = vpop.f32.mrf.mxu1 }
 0x716   : > { %v3004_v30 = vpack.c.bf16 %v3000_v26, %v3000_v26  ;;  %v3006_v2 = vpack.c.bf16 %v3002_v27, %v3002_v27 }
 0x718   : > { %3302 = vmatprep.mubr.bf16.mxu0 %v3004_v30  ;;  %3342 = vmatprep.mubr.bf16.mxu1 %v3006_v2 }
 0x719   : > { %3303 = vmatmul.mubr.bf16.vlgmr.msra.gmra.mxu0 %v3003_v31  ;;  %3343 = vmatmul.mubr.bf16.vlgmr.msra.gmra.mxu1 %v3005_v32 }
 0x7d9   : > { %v3962_v33 = vpop.f32.mrf.mxu0  ;;  %v3984_v35 = vpop.f32.mrf.mxu1 }
 0x7db   : > { %v3963_v37 = vpop.f32.mrf.mxu0  ;;  %v3985_v38 = vpop.f32.mrf.mxu1 }
 0x7dc   : > { %v3964_v39 = vadd.f32 %v3963_v37, %v3962_v33  ;;  %v3986_v43 = vadd.f32 %v3985_v38, %v3984_v35 }
 0x7dd   : > { %v3965_v40 = vpop.f32.mrf.mxu0  ;;  %v3987_v41 = vpop.f32.mrf.mxu1 }
 0x7de   : > { %v3305_v42 = vadd.f32 %v3964_v39, %v3768_v36 }
 0x7df   : > { %v3966_v44 = vpop.f32.mrf.mxu0  ;;  %v3988_v45 = vpop.f32.mrf.mxu1 }
 0x7e0   : > { %v3345_v46 = vadd.f32 %v3986_v43, %v3305_v42 }
 0x7e2   : > { %v3350_v47 = vadd.f32 %v3345_v46, %v5283_v34  ;;  %v3801_v34 = vld [vmem:[%s642_s3] ss:$0 sm:$0xff]  ;;  %s4688_s3 = smov [#allocation2]  }
 0x7e3   : > { %s4595_s30 = sshll.u32 %s4688_s3, 4  ;;  %s4596_s30 = int_to_ptr.vmem [resolvable:$false] %s4595_s30 }
 0x7e4   : > { %3351 = vadd.xlane.f32.xlu0 %v3350_v47  ;;  %s4597_s6 = scalar_lea.vmem %s4596_s30, 256  ;;  %p4598_p5 = scmp.lt.s32.totalorder %s3394_s0, %s4596_s30 }
 0x7e5   : > { %p4599_p6 = scmp.lt.s32.totalorder %s4597_s6, %s4591_s17 }
 0x7e7   : > { %p4600_p7 = por %p4599_p6, %p4598_p5 }
 0x7e9   : > { %p4601_p8 = pnand %p4600_p7, %p4594_p4 }
 0x86d   : > { %v3352_v48 = vpop.xlane.xlu0 %3351 }
 0x86e   : > { %v3353_v19 = vmul.f32 0.0078125, %v3352_v48 }
 0x870   : > { %v3354_v49 = vsub.f32 %v3350_v47, %v3353_v19 }
 0x872   : > { %v3355_v50 = vmul.f32 %v3354_v49, %v3354_v49 }
 0x874   : > { %3356 = vadd.xlane.f32.xlu1 %v3355_v50 }
 0x8fd   : > { %v3357_v51 = vpop.xlane.xlu1 %3356 }
 0x8fe   : > { %v3358_v52 = vmul.f32 0.0078125, %v3357_v51 }
 0x900   : > { %v3359_v53 = vadd.f32 1e-05, %v3358_v52 }
 0x902   : > { %4588 = vrsqrt.f32 %v3359_v53 }
 0x90f   : > { %v4589_v54 = vpop.eup %4588 }
 0x910   : > { %v3361_v55 = vmul.f32 %v4589_v54, %v3354_v49 }
 0x912   : > { %v3369_v57 = vmul.f32 %v3801_v34, %v3361_v55 }
 0x914   : > { %v3377_v58 = vadd.f32 %v3802_v56, %v3369_v57 }
 0x916   : > { %3378 = vst [vmem:[%s4899_s24] sm:$0xff] %v3377_v58 }
 0x917   : > { %4604 = shalt.err (!%p4601_p8)
}
 0x918   : > { %s4605_s19 = scalar_lea.hbm %s3391_s26, 128  ;;  %s4609_s13 = scalar_lea.hbm %s5450_s7, 256 }
 0x919   : > { %p4606_p10 = scmp.ne.s32.totalorder %s3391_s26, %s4605_s19  ;;  %p4610_p13 = scmp.lt.s32.totalorder %s3391_s26, %s5450_s7 }
 0x91a   : > { %p4611_p0 = scmp.lt.s32.totalorder %s4609_s13, %s4605_s19 }
 0x91b   : > { %p4607_p11 = pnand %p4606_p10, %p4808_p3 }
 0x91c   : > { %p4612_p1 = por %p4611_p0, %p4610_p13 }
 0x91d   : > { %p4608_p12 = pneg %p4607_p11 }
 0x91f   : > { %p4613_p2 = pnand %p4612_p1, %p4608_p12 }
 0x921   : > { %4616 = shalt.err (!%p4613_p2)
}
 0x922   : > { %4312 = dma.vmem_to_hbm [thread:$0]  (%p4808_p3), %s3394_s0, 128, %s3391_s26, %s3380_s15  }
 0x923 PF: > { %s5452_s22 = sld [smem:[#allocation12_spill]] }
 0x924   : > { %s5453_s12 = sld [smem:[#allocation5_spill]] }
 0x929   : > { %p4318_p4 = scmp.ge.s32.totalorder %s5452_s22, 2 }
 0x92a   : > { %s3405_s21 = sand.u32 1, %s5453_s12  }
 0x92b   : > { %p4315_p5 = pnand %p4318_p4, %p4818_p9  ;;  %s3406_s16 = scalar_lea.sflag [#allocation3], %s3405_s21 }
 0x92d   : > { %p4316_p6 = pneg %p4315_p5 }
 0x92f   : > { %4650 = dma.done.wait (%p4316_p6), %s3406_s16, 128  }
 0x930   : > { %4652 = vsyncadd (%p4316_p6), %s3406_s16, 4294967168  ;;  %s26_s15 = sadd.s32 1, %s5452_s22   ;;  %s5455_s25 = sld [smem:[#allocation6_spill]] }
 0x931   : > { %p23_p7 = scmp.ge.s32.totalorder %s26_s15, 6   ;;  %s5456_s26 = sld [smem:[#allocation7_spill]] }
 0x932   : > { %s5457_s27 = sld [smem:[#allocation17_spill]] }
 0x933   : > { %s5458_s28 = sld [smem:[#allocation10_spill]]  ;;  %25 = sbr.rel (!%p23_p7) target bundleno = 14 (0xe), region = 147 }
 0x934   : > { %s5459_s29 = sld [smem:[#allocation11_spill]] }
 0x935   : > { %s5460_s30 = sld [smem:[#allocation13_spill]] }
 0x936   : > { %s5461_s14 = sld [smem:[#allocation15_spill]] }
 0x938   :  { %3411 = vsyncpa [#allocation3], 1 }
 0x939   :  { %3413 = vsyncpa [#allocation3 + $0x1], 1 }

</bundles_post_ra>
